<compile_context>
chip_gen: v7x
topology: tpu7x:2x2x1
jax: 0.10.0
libtpu: 0.0.40
codegen_flags: <defaults>
</compile_context>

<pallas_src>
import jax
import jax.numpy as jnp
from jax.experimental import pallas as pl
from jax.experimental.pallas import tpu as pltpu


# ----------------------------------------------------------------------------
# Kernel: row-tiled GCN aggregation for all three views + readout partials
# ----------------------------------------------------------------------------
def _conag_gcn_kernel(fts12_ref, fts3_ref, adj_ref, adj3_ref, msk_ref,
                      bg2_ref, bg_ref, alpha_ref,          # inputs
                      h12_ref, h3_ref, cpart_ref):         # outputs
    alpha = alpha_ref[0, 0]                                # PReLU slope (SMEM)

    def prelu(x):
        return jnp.where(x > 0, x, alpha * x)

    # h1 | h2 share adj -> one widened (T, Np) @ (Np, 2H) MXU matmul (bf16 in,
    # f32 accumulate); h3 pairs with adj3.
    h12 = jnp.dot(adj_ref[...], fts12_ref[...],
                  preferred_element_type=jnp.float32)      # (T, 2H) f32
    h12 = prelu(h12 + bg2_ref[...])                        # doubled bias [b|b]
    h3 = jnp.dot(adj3_ref[...], fts3_ref[...],
                 preferred_element_type=jnp.float32)       # (T, H) f32
    h3 = prelu(h3 + bg_ref[...])

    # Masked AvgReadout partial sum over this row tile (f32, before bf16 cast).
    # Replicated over 8 sublanes so the output block is (8, 2H)-tileable.
    part = jnp.sum(h12 * msk_ref[...], axis=0, keepdims=True)   # (1, 2H)
    cpart_ref[...] = jnp.broadcast_to(part, cpart_ref.shape)    # (8, 2H)

    # Lane-dense bf16 hidden-state writeback (consumed by the XLA epilogue).
    h12_ref[...] = h12.astype(h12_ref.dtype)
    h3_ref[...] = h3.astype(h3_ref.dtype)


# ----------------------------------------------------------------------------
# Wrapper: feature transform (hoisted), padding/tiling, kernel, tiny epilogue
# ----------------------------------------------------------------------------
def _round_up(x, m):
    return (x + m - 1) // m * m


def conag_forward(params, seq1, seq2, seq3, adj, adj3, sparse=False,
                  msk=None, samp_bias1=None, samp_bias2=None, tile_n=None):
    # TODO(synk): sparse adjacency (torch.spmm) path is not kernelized.
    assert not sparse, "sparse adjacency path not implemented"
    B, N, F_in = seq1.shape
    assert B == 1, "kernel assumes batch size 1 (as in DGI usage)"
    H = params["w_gcn"].shape[1]
    f32, bf16 = jnp.float32, jnp.bfloat16

    # ---- hardware query: VMEM capacity drives tile cap + scoped limit ------
    try:
        vmem_cap = int(getattr(pltpu.get_tpu_info(), "vmem_capacity_bytes"))
    except Exception:                                   # be conservative (v7x)
        vmem_cap = 64 * 1024 * 1024

    # ---- row tile (128-aligned) + zero padding of the node dimension -------
    if tile_n is None:
        # <=256 is safe on v7x (64 MiB VMEM); allow 512 on 128 MiB parts for
        # large graphs (amortizes per-step overhead, better MXU fill).
        cap = 512 if (vmem_cap >= (100 << 20) and N >= 2048) else 256
        tile_n = min(cap, _round_up(N, 128))
    tile_n = max(128, _round_up(int(tile_n), 128))
    Np = _round_up(N, tile_n)
    num_tiles = Np // tile_n
    pad_n = Np - N

    # ---- one-time feature transform, hoisted out of the grid (plain XLA) ---
    w_gcn = params["w_gcn"].astype(f32)
    seq_all = jnp.concatenate([seq1[0], seq2[0], seq3[0]], axis=0).astype(f32)
    fts = jnp.dot(seq_all, w_gcn)                              # (3N, H) f32
    fts12 = jnp.concatenate([fts[:N], fts[N:2 * N]], axis=1)   # (N, 2H)
    fts12 = jnp.pad(fts12, ((0, pad_n), (0, 0))).astype(bf16)  # (Np, 2H)
    fts3 = jnp.pad(fts[2 * N:], ((0, pad_n), (0, 0))).astype(bf16)

    adj_p = jnp.pad(adj[0], ((0, pad_n), (0, pad_n))).astype(bf16)
    adj3_p = jnp.pad(adj3[0], ((0, pad_n), (0, pad_n))).astype(bf16)

    if msk is None:
        msk_col = jnp.ones((N, 1), f32)
        denom = jnp.float32(N)                      # mean over real nodes
    else:
        msk_col = msk.reshape(N, 1).astype(f32)
        denom = jnp.sum(msk_col)
    msk_col = jnp.pad(msk_col, ((0, pad_n), (0, 0)))   # padded rows excluded

    bg = params["b_gcn"].reshape(1, H).astype(f32)
    bg2 = jnp.concatenate([bg, bg], axis=1)            # pre-doubled (1, 2H)
    alpha = params["alpha"].reshape(1, 1).astype(f32)  # SMEM scalar

    # ---- explicit scoped-VMEM budget ----------------------------------------
    need = (
        2 * 2 * tile_n * Np * 2            # adj + adj3 row tiles, double-buffered
        + Np * 3 * H * 2                   # fts12 + fts3 (single-buffered)
        + 2 * tile_n * 3 * H * 2           # h12 + h3 output tiles (2 buffers)
        + 2 * (tile_n * 4 + 8 * 2 * H * 4 + 3 * H * 4)   # msk, cpart, biases
    )
    vmem_limit = max(int(need * 1.3), 16 << 20)
    vmem_limit = min(vmem_limit, int(0.9 * vmem_cap))

    out_shape = (
        jax.ShapeDtypeStruct((Np, 2 * H), bf16),               # [h1 | h2]
        jax.ShapeDtypeStruct((Np, H), bf16),                   # h3
        jax.ShapeDtypeStruct((8 * num_tiles, 2 * H), f32),     # readout partials
    )

    def _run(single_buffer_invariants):
        inv = ({"pipeline_mode": pl.Buffered(1)}
               if single_buffer_invariants else {})
        in_specs = [
            pl.BlockSpec((Np, 2 * H), lambda i: (0, 0), **inv),   # fts12
            pl.BlockSpec((Np, H), lambda i: (0, 0), **inv),       # fts3
            pl.BlockSpec((tile_n, Np), lambda i: (i, 0)),          # adj tile
            pl.BlockSpec((tile_n, Np), lambda i: (i, 0)),          # adj3 tile
            pl.BlockSpec((tile_n, 1), lambda i: (i, 0)),           # mask tile
            pl.BlockSpec((1, 2 * H), lambda i: (0, 0), **inv),     # doubled bias
            pl.BlockSpec((1, H), lambda i: (0, 0), **inv),         # bias
            pl.BlockSpec(memory_space=pltpu.MemorySpace.SMEM),     # PReLU slope
        ]
        out_specs = [
            pl.BlockSpec((tile_n, 2 * H), lambda i: (i, 0)),
            pl.BlockSpec((tile_n, H), lambda i: (i, 0)),
            pl.BlockSpec((8, 2 * H), lambda i: (i, 0)),
        ]
        return pl.pallas_call(
            _conag_gcn_kernel,
            out_shape=out_shape,
            grid_spec=pltpu.PrefetchScalarGridSpec(
                num_scalar_prefetch=0,
                grid=(num_tiles,),
                in_specs=in_specs,
                out_specs=out_specs),
            compiler_params=pltpu.CompilerParams(
                # No cross-tile carry -> row tiles are independent (v7x can
                # shard them across its two TensorCores).
                dimension_semantics=("parallel",),
                vmem_limit_bytes=vmem_limit),
        )(fts12, fts3, adj_p, adj3_p, msk_col, bg2, bg, alpha)

    try:
        h12_out, h3_out, cpart = _run(True)
    except Exception:       # fallback for jax versions without pipeline_mode
        h12_out, h3_out, cpart = _run(False)

    # ---- tiny XLA epilogue: sigmoid(readout) + bilinear discriminator ------
    c = jax.nn.sigmoid(jnp.sum(cpart[::8, :H], axis=0) / denom)    # (H,) f32

    h1 = h12_out[:N, :H].astype(f32)
    h2 = h12_out[:N, H:].astype(f32)
    h3 = h3_out[:N].astype(f32)

    w_bil = params["w_bil"].astype(f32)
    b_bil = params["b_bil"].astype(f32)
    u = w_bil @ c                           # sc[n] = h[n] @ W_bil @ c + b_bil
    sc1 = h1 @ u + b_bil
    sc2 = h2 @ u + b_bil
    sc3 = h3 @ u + b_bil
    if samp_bias1 is not None:
        sc1 = sc1 + samp_bias1.reshape(-1)
    if samp_bias2 is not None:
        sb2 = samp_bias2.reshape(-1)
        sc2 = sc2 + sb2[:N]
        sc3 = sc3 + sb2[N:]
    return jnp.concatenate([sc1, sc2, sc3]).reshape(1, 3 * N)


# ----------------------------------------------------------------------------
# Pure-JAX reference (mirrors the PyTorch forward, f32 highest precision)
# ----------------------------------------------------------------------------
def conag_ref(params, seq1, seq2, seq3, adj, adj3, msk=None,
              samp_bias1=None, samp_bias2=None):
    hp = jax.lax.Precision.HIGHEST

    def gcn(seq, a):
        seq_fts = jnp.einsum("bnf,fh->bnh", seq, params["w_gcn"], precision=hp)
        h = jnp.einsum("bnm,bmh->bnh", a, seq_fts, precision=hp) + params["b_gcn"]
        return jnp.where(h > 0, h, params["alpha"] * h)

    h1 = gcn(seq1, adj)
    h2 = gcn(seq2, adj)
    h3 = gcn(seq3, adj3)

    if msk is None:
        c = jnp.mean(h1, axis=1)
    else:
        m = msk[..., None]
        c = jnp.sum(h1 * m, axis=1) / jnp.sum(m)
    c = jax.nn.sigmoid(c)                                   # (1, H)

    h_neg = jnp.concatenate([h2, h3], axis=1)               # (1, 2N, H)

    def bilin(h):
        return (jnp.einsum("bnh,hk,bk->bn", h, params["w_bil"], c, precision=hp)
                + params["b_bil"])

    sc1 = bilin(h1)
    sc2 = bilin(h_neg)
    if samp_bias1 is not None:
        sc1 = sc1 + samp_bias1
    if samp_bias2 is not None:
        sc2 = sc2 + samp_bias2
    return jnp.concatenate([sc1, sc2], axis=1)


# ----------------------------------------------------------------------------
if __name__ == "__main__":
    key = jax.random.PRNGKey(0)
    B, N, n_in, n_h = 1, 320, 64, 32     # N=320 -> padded to 384, 3 row tiles

    ks = jax.random.split(key, 10)
    seq1 = jax.random.normal(ks[0], (B, N, n_in), jnp.float32)
    seq2 = jax.random.normal(ks[1], (B, N, n_in), jnp.float32)   # corrupted view
    seq3 = jax.random.normal(ks[2], (B, N, n_in), jnp.float32)   # second neg view
    a_raw = jax.random.uniform(ks[3], (B, N, N), jnp.float32)
    adj = a_raw / jnp.sum(a_raw, axis=-1, keepdims=True)         # row-normalized
    a3_raw = jax.random.uniform(ks[4], (B, N, N), jnp.float32)
    adj3 = a3_raw / jnp.sum(a3_raw, axis=-1, keepdims=True)

    params = {
        "w_gcn": 0.1 * jax.random.normal(ks[5], (n_in, n_h), jnp.float32),
        "b_gcn": jnp.zeros((n_h,), jnp.float32),
        "alpha": jnp.array(0.25, jnp.float32),       # PReLU default slope
        "w_bil": 0.1 * jax.random.normal(ks[6], (n_h, n_h), jnp.float32),
        "b_bil": jnp.zeros((), jnp.float32),
    }

    # Case 1: typical DGI call (no mask, no sampling biases). tile_n=128 forces
    # a multi-step grid + node padding path even at this small size.
    out1 = conag_forward(params, seq1, seq2, seq3, adj, adj3, sparse=False,
                         tile_n=128)
    out1 = jax.block_until_ready(out1)
    ref1 = conag_ref(params, seq1, seq2, seq3, adj, adj3)
    assert out1.shape == (1, 3 * N), out1.shape
    err1 = float(jnp.max(jnp.abs(out1 - ref1)))
    assert jnp.allclose(out1, ref1, rtol=2e-2, atol=2e-2), ("mismatch", err1)

    # Case 2: with mask and sampling biases.
    msk = (jax.random.uniform(ks[7], (B, N)) > 0.3).astype(jnp.float32)
    sb1 = 0.1 * jax.random.normal(ks[8], (B, N), jnp.float32)
    sb2 = 0.1 * jax.random.normal(ks[9], (B, 2 * N), jnp.float32)
    out2 = conag_forward(params, seq1, seq2, seq3, adj, adj3, sparse=False,
                         msk=msk, samp_bias1=sb1, samp_bias2=sb2, tile_n=128)
    out2 = jax.block_until_ready(out2)
    ref2 = conag_ref(params, seq1, seq2, seq3, adj, adj3, msk, sb1, sb2)
    err2 = float(jnp.max(jnp.abs(out2 - ref2)))
    assert jnp.allclose(out2, ref2, rtol=2e-2, atol=2e-2), ("mismatch", err2)

    print("KERNEL_OK")
</pallas_src>

<mosaic_0001>
module attributes {stable_mosaic.version = 11 : i64} {
  func.func @_conag_gcn_kernel(%arg0: i32, %arg1: memref<384x64xbf16, #tpu.memory_space<vmem>>, %arg2: memref<384x32xbf16, #tpu.memory_space<vmem>>, %arg3: memref<128x384xbf16, #tpu.memory_space<vmem>>, %arg4: memref<128x384xbf16, #tpu.memory_space<vmem>>, %arg5: memref<128x1xf32, #tpu.memory_space<vmem>>, %arg6: memref<1x64xf32, #tpu.memory_space<vmem>>, %arg7: memref<1x32xf32, #tpu.memory_space<vmem>>, %arg8: memref<1x1xf32, #tpu.memory_space<smem>>, %arg9: memref<128x64xbf16, #tpu.memory_space<vmem>>, %arg10: memref<128x32xbf16, #tpu.memory_space<vmem>>, %arg11: memref<8x64xf32, #tpu.memory_space<vmem>>) attributes {dimension_semantics = [#tpu.dimension_semantics<parallel>], iteration_bounds = array<i64: 3>, scalar_prefetch = 0 : i64, scratch_operands = 0 : i64, tpu.core_type = #tpu.core_type<tc>, window_params = [{pipeline_mode = #tpu.pipeline_mode<synchronous>, transform_indices = @transform_0, window_bounds = array<i64: 384, 64>}, {pipeline_mode = #tpu.pipeline_mode<synchronous>, transform_indices = @transform_1, window_bounds = array<i64: 384, 32>}, {transform_indices = @transform_2, window_bounds = array<i64: 128, 384>}, {transform_indices = @transform_3, window_bounds = array<i64: 128, 384>}, {transform_indices = @transform_4, window_bounds = array<i64: 128, 1>}, {pipeline_mode = #tpu.pipeline_mode<synchronous>, transform_indices = @transform_5, window_bounds = array<i64: 1, 64>}, {pipeline_mode = #tpu.pipeline_mode<synchronous>, transform_indices = @transform_6, window_bounds = array<i64: 1, 32>}, {transform_indices = @transform_7, window_bounds = array<i64: 1, 1>}, {transform_indices = @transform_8, window_bounds = array<i64: 128, 64>}, {transform_indices = @transform_9, window_bounds = array<i64: 128, 32>}, {transform_indices = @transform_10, window_bounds = array<i64: 8, 64>}]} {
    %c0 = arith.constant 0 : index
    %c0_0 = arith.constant 0 : index
    %0 = memref.load %arg8[%c0, %c0_0] : memref<1x1xf32, #tpu.memory_space<smem>>
    %c0_1 = arith.constant 0 : index
    %c0_2 = arith.constant 0 : index
    %1 = vector.load %arg3[%c0_1, %c0_2] : memref<128x384xbf16, #tpu.memory_space<vmem>>, vector<128x384xbf16>
    %c0_3 = arith.constant 0 : index
    %c0_4 = arith.constant 0 : index
    %2 = vector.load %arg1[%c0_3, %c0_4] : memref<384x64xbf16, #tpu.memory_space<vmem>>, vector<384x64xbf16>
    %cst = arith.constant dense<0.000000e+00> : vector<128x64xf32>
    %3 = tpu.matmul %1, %2, %cst {dimension_numbers = #tpu.dot_dimension_numbers<[1], [0], [0], [1], [0, 0, 1, 1], [], []>} : vector<128x384xbf16>, vector<384x64xbf16>, vector<128x64xf32> -> vector<128x64xf32>
    %c0_5 = arith.constant 0 : index
    %c0_6 = arith.constant 0 : index
    %4 = vector.load %arg6[%c0_5, %c0_6] : memref<1x64xf32, #tpu.memory_space<vmem>>, vector<1x64xf32>
    %5 = vector.broadcast %4 : vector<1x64xf32> to vector<128x64xf32>
    %6 = arith.addf %3, %5 : vector<128x64xf32>
    %cst_7 = arith.constant 0.000000e+00 : f32
    %7 = vector.broadcast %cst_7 : f32 to vector<128x64xf32>
    %8 = arith.cmpf ogt, %6, %7 : vector<128x64xf32>
    %9 = vector.broadcast %0 : f32 to vector<128x64xf32>
    %10 = arith.mulf %9, %6 : vector<128x64xf32>
    %11 = arith.select %8, %6, %10 : vector<128x64xi1>, vector<128x64xf32>
    %c0_8 = arith.constant 0 : index
    %c0_9 = arith.constant 0 : index
    %12 = vector.load %arg4[%c0_8, %c0_9] : memref<128x384xbf16, #tpu.memory_space<vmem>>, vector<128x384xbf16>
    %c0_10 = arith.constant 0 : index
    %c0_11 = arith.constant 0 : index
    %13 = vector.load %arg2[%c0_10, %c0_11] : memref<384x32xbf16, #tpu.memory_space<vmem>>, vector<384x32xbf16>
    %cst_12 = arith.constant dense<0.000000e+00> : vector<128x32xf32>
    %14 = tpu.matmul %12, %13, %cst_12 {dimension_numbers = #tpu.dot_dimension_numbers<[1], [0], [0], [1], [0, 0, 1, 1], [], []>} : vector<128x384xbf16>, vector<384x32xbf16>, vector<128x32xf32> -> vector<128x32xf32>
    %c0_13 = arith.constant 0 : index
    %c0_14 = arith.constant 0 : index
    %15 = vector.load %arg7[%c0_13, %c0_14] : memref<1x32xf32, #tpu.memory_space<vmem>>, vector<1x32xf32>
    %16 = vector.broadcast %15 : vector<1x32xf32> to vector<128x32xf32>
    %17 = arith.addf %14, %16 : vector<128x32xf32>
    %cst_15 = arith.constant 0.000000e+00 : f32
    %18 = vector.broadcast %cst_15 : f32 to vector<128x32xf32>
    %19 = arith.cmpf ogt, %17, %18 : vector<128x32xf32>
    %20 = vector.broadcast %0 : f32 to vector<128x32xf32>
    %21 = arith.mulf %20, %17 : vector<128x32xf32>
    %22 = arith.select %19, %17, %21 : vector<128x32xi1>, vector<128x32xf32>
    %c0_16 = arith.constant 0 : index
    %c0_17 = arith.constant 0 : index
    %23 = vector.load %arg5[%c0_16, %c0_17] : memref<128x1xf32, #tpu.memory_space<vmem>>, vector<128x1xf32>
    %24 = vector.broadcast %23 : vector<128x1xf32> to vector<128x64xf32>
    %25 = arith.mulf %11, %24 : vector<128x64xf32>
    %cst_18 = arith.constant dense<0.000000e+00> : vector<64xf32>
    %26 = vector.multi_reduction <add>, %25, %cst_18 [0] : vector<128x64xf32> to vector<64xf32>
    %27 = vector.shape_cast %26 : vector<64xf32> to vector<1x64xf32>
    %28 = vector.shape_cast %27 : vector<1x64xf32> to vector<1x64xf32>
    %29 = vector.broadcast %28 : vector<1x64xf32> to vector<8x64xf32>
    %c0_19 = arith.constant 0 : index
    %c0_20 = arith.constant 0 : index
    %30 = vector.load %arg11[%c0_19, %c0_20] : memref<8x64xf32, #tpu.memory_space<vmem>>, vector<8x64xf32>
    tpu.vector_store %arg11[%c0_19, %c0_20], %29 {strides = array<i32>} : memref<8x64xf32, #tpu.memory_space<vmem>>, vector<8x64xf32>,
    %31 = arith.truncf %11 : vector<128x64xf32> to vector<128x64xbf16>
    %c0_21 = arith.constant 0 : index
    %c0_22 = arith.constant 0 : index
    %32 = vector.load %arg9[%c0_21, %c0_22] : memref<128x64xbf16, #tpu.memory_space<vmem>>, vector<128x64xbf16>
    tpu.vector_store %arg9[%c0_21, %c0_22], %31 {strides = array<i32>} : memref<128x64xbf16, #tpu.memory_space<vmem>>, vector<128x64xbf16>,
    %33 = arith.truncf %22 : vector<128x32xf32> to vector<128x32xbf16>
    %c0_23 = arith.constant 0 : index
    %c0_24 = arith.constant 0 : index
    %34 = vector.load %arg10[%c0_23, %c0_24] : memref<128x32xbf16, #tpu.memory_space<vmem>>, vector<128x32xbf16>
    tpu.vector_store %arg10[%c0_23, %c0_24], %33 {strides = array<i32>} : memref<128x32xbf16, #tpu.memory_space<vmem>>, vector<128x32xbf16>,
    return
  }
  func.func @transform_0(%arg0: i32) -> (i32, i32) {
    %c0_i32 = arith.constant 0 : i32
    %c0_i32_0 = arith.constant 0 : i32
    %c0_i32_1 = arith.constant 0 : i32
    return %c0_i32, %c0_i32_0 : i32, i32
  }
  func.func @transform_1(%arg0: i32) -> (i32, i32) {
    %c0_i32 = arith.constant 0 : i32
    %c0_i32_0 = arith.constant 0 : i32
    %c0_i32_1 = arith.constant 0 : i32
    return %c0_i32, %c0_i32_0 : i32, i32
  }
  func.func @transform_2(%arg0: i32) -> (i32, i32) {
    %c0_i32 = arith.constant 0 : i32
    %c0_i32_0 = arith.constant 0 : i32
    return %arg0, %c0_i32 : i32, i32
  }
  func.func @transform_3(%arg0: i32) -> (i32, i32) {
    %c0_i32 = arith.constant 0 : i32
    %c0_i32_0 = arith.constant 0 : i32
    return %arg0, %c0_i32 : i32, i32
  }
  func.func @transform_4(%arg0: i32) -> (i32, i32) {
    %c0_i32 = arith.constant 0 : i32
    %c0_i32_0 = arith.constant 0 : i32
    return %arg0, %c0_i32 : i32, i32
  }
  func.func @transform_5(%arg0: i32) -> (i32, i32) {
    %c0_i32 = arith.constant 0 : i32
    %c0_i32_0 = arith.constant 0 : i32
    %c0_i32_1 = arith.constant 0 : i32
    return %c0_i32, %c0_i32_0 : i32, i32
  }
  func.func @transform_6(%arg0: i32) -> (i32, i32) {
    %c0_i32 = arith.constant 0 : i32
    %c0_i32_0 = arith.constant 0 : i32
    %c0_i32_1 = arith.constant 0 : i32
    return %c0_i32, %c0_i32_0 : i32, i32
  }
  func.func @transform_7(%arg0: i32) -> (i32, i32) {
    %c0_i32 = arith.constant 0 : i32
    %c0_i32_0 = arith.constant 0 : i32
    %c0_i32_1 = arith.constant 0 : i32
    return %c0_i32, %c0_i32_0 : i32, i32
  }
  func.func @transform_8(%arg0: i32) -> (i32, i32) {
    %c0_i32 = arith.constant 0 : i32
    %c0_i32_0 = arith.constant 0 : i32
    return %arg0, %c0_i32 : i32, i32
  }
  func.func @transform_9(%arg0: i32) -> (i32, i32) {
    %c0_i32 = arith.constant 0 : i32
    %c0_i32_0 = arith.constant 0 : i32
    return %arg0, %c0_i32 : i32, i32
  }
  func.func @transform_10(%arg0: i32) -> (i32, i32) {
    %c0_i32 = arith.constant 0 : i32
    %c0_i32_0 = arith.constant 0 : i32
    return %arg0, %c0_i32 : i32, i32
  }
}

module attributes {stable_mosaic.version = 11 : i64} {
  func.func @_conag_gcn_kernel(%arg0: i32, %arg1: memref<384x64xbf16, #tpu.memory_space<vmem>>, %arg2: memref<384x32xbf16, #tpu.memory_space<vmem>>, %arg3: memref<128x384xbf16, #tpu.memory_space<vmem>>, %arg4: memref<128x384xbf16, #tpu.memory_space<vmem>>, %arg5: memref<128x1xf32, #tpu.memory_space<vmem>>, %arg6: memref<1x64xf32, #tpu.memory_space<vmem>>, %arg7: memref<1x32xf32, #tpu.memory_space<vmem>>, %arg8: memref<1x1xf32, #tpu.memory_space<smem>>, %arg9: memref<128x64xbf16, #tpu.memory_space<vmem>>, %arg10: memref<128x32xbf16, #tpu.memory_space<vmem>>, %arg11: memref<8x64xf32, #tpu.memory_space<vmem>>) attributes {dimension_semantics = [#tpu.dimension_semantics<parallel>], iteration_bounds = array<i64: 3>, scalar_prefetch = 0 : i64, scratch_operands = 0 : i64, tpu.core_type = #tpu.core_type<tc>, window_params = [{pipeline_mode = #tpu.pipeline_mode<synchronous>, transform_indices = @transform_0, window_bounds = array<i64: 384, 64>}, {pipeline_mode = #tpu.pipeline_mode<synchronous>, transform_indices = @transform_1, window_bounds = array<i64: 384, 32>}, {transform_indices = @transform_2, window_bounds = array<i64: 128, 384>}, {transform_indices = @transform_3, window_bounds = array<i64: 128, 384>}, {transform_indices = @transform_4, window_bounds = array<i64: 128, 1>}, {pipeline_mode = #tpu.pipeline_mode<synchronous>, transform_indices = @transform_5, window_bounds = array<i64: 1, 64>}, {pipeline_mode = #tpu.pipeline_mode<synchronous>, transform_indices = @transform_6, window_bounds = array<i64: 1, 32>}, {transform_indices = @transform_7, window_bounds = array<i64: 1, 1>}, {transform_indices = @transform_8, window_bounds = array<i64: 128, 64>}, {transform_indices = @transform_9, window_bounds = array<i64: 128, 32>}, {transform_indices = @transform_10, window_bounds = array<i64: 8, 64>}]} {
    %c0 = arith.constant 0 : index
    %c0_0 = arith.constant 0 : index
    %0 = memref.load %arg8[%c0, %c0_0] : memref<1x1xf32, #tpu.memory_space<smem>>
    %c0_1 = arith.constant 0 : index
    %c0_2 = arith.constant 0 : index
    %1 = vector.load %arg3[%c0_1, %c0_2] : memref<128x384xbf16, #tpu.memory_space<vmem>>, vector<128x384xbf16>
    %c0_3 = arith.constant 0 : index
    %c0_4 = arith.constant 0 : index
    %2 = vector.load %arg1[%c0_3, %c0_4] : memref<384x64xbf16, #tpu.memory_space<vmem>>, vector<384x64xbf16>
    %cst = arith.constant dense<0.000000e+00> : vector<128x64xf32>
    %3 = tpu.matmul %1, %2, %cst {dimension_numbers = #tpu.dot_dimension_numbers<[1], [0], [0], [1], [0, 0, 1, 1], [], []>} : vector<128x384xbf16>, vector<384x64xbf16>, vector<128x64xf32> -> vector<128x64xf32>
    %c0_5 = arith.constant 0 : index
    %c0_6 = arith.constant 0 : index
    %4 = vector.load %arg6[%c0_5, %c0_6] : memref<1x64xf32, #tpu.memory_space<vmem>>, vector<1x64xf32>
    %5 = vector.broadcast %4 : vector<1x64xf32> to vector<128x64xf32>
    %6 = arith.addf %3, %5 : vector<128x64xf32>
    %cst_7 = arith.constant 0.000000e+00 : f32
    %7 = vector.broadcast %cst_7 : f32 to vector<128x64xf32>
    %8 = arith.cmpf ogt, %6, %7 : vector<128x64xf32>
    %9 = vector.broadcast %0 : f32 to vector<128x64xf32>
    %10 = arith.mulf %9, %6 : vector<128x64xf32>
    %11 = arith.select %8, %6, %10 : vector<128x64xi1>, vector<128x64xf32>
    %c0_8 = arith.constant 0 : index
    %c0_9 = arith.constant 0 : index
    %12 = vector.load %arg4[%c0_8, %c0_9] : memref<128x384xbf16, #tpu.memory_space<vmem>>, vector<128x384xbf16>
    %c0_10 = arith.constant 0 : index
    %c0_11 = arith.constant 0 : index
    %13 = vector.load %arg2[%c0_10, %c0_11] : memref<384x32xbf16, #tpu.memory_space<vmem>>, vector<384x32xbf16>
    %cst_12 = arith.constant dense<0.000000e+00> : vector<128x32xf32>
    %14 = tpu.matmul %12, %13, %cst_12 {dimension_numbers = #tpu.dot_dimension_numbers<[1], [0], [0], [1], [0, 0, 1, 1], [], []>} : vector<128x384xbf16>, vector<384x32xbf16>, vector<128x32xf32> -> vector<128x32xf32>
    %c0_13 = arith.constant 0 : index
    %c0_14 = arith.constant 0 : index
    %15 = vector.load %arg7[%c0_13, %c0_14] : memref<1x32xf32, #tpu.memory_space<vmem>>, vector<1x32xf32>
    %16 = vector.broadcast %15 : vector<1x32xf32> to vector<128x32xf32>
    %17 = arith.addf %14, %16 : vector<128x32xf32>
    %cst_15 = arith.constant 0.000000e+00 : f32
    %18 = vector.broadcast %cst_15 : f32 to vector<128x32xf32>
    %19 = arith.cmpf ogt, %17, %18 : vector<128x32xf32>
    %20 = vector.broadcast %0 : f32 to vector<128x32xf32>
    %21 = arith.mulf %20, %17 : vector<128x32xf32>
    %22 = arith.select %19, %17, %21 : vector<128x32xi1>, vector<128x32xf32>
    %c0_16 = arith.constant 0 : index
    %c0_17 = arith.constant 0 : index
    %23 = vector.load %arg5[%c0_16, %c0_17] : memref<128x1xf32, #tpu.memory_space<vmem>>, vector<128x1xf32>
    %24 = vector.broadcast %23 : vector<128x1xf32> to vector<128x64xf32>
    %25 = arith.mulf %11, %24 : vector<128x64xf32>
    %cst_18 = arith.constant dense<0.000000e+00> : vector<64xf32>
    %26 = vector.multi_reduction <add>, %25, %cst_18 [0] : vector<128x64xf32> to vector<64xf32>
    %27 = vector.shape_cast %26 : vector<64xf32> to vector<1x64xf32>
    %28 = vector.shape_cast %27 : vector<1x64xf32> to vector<1x64xf32>
    %29 = vector.broadcast %28 : vector<1x64xf32> to vector<8x64xf32>
    %c0_19 = arith.constant 0 : index
    %c0_20 = arith.constant 0 : index
    %30 = vector.load %arg11[%c0_19, %c0_20] : memref<8x64xf32, #tpu.memory_space<vmem>>, vector<8x64xf32>
    tpu.vector_store %arg11[%c0_19, %c0_20], %29 {strides = array<i32>} : memref<8x64xf32, #tpu.memory_space<vmem>>, vector<8x64xf32>,
    %31 = arith.truncf %11 : vector<128x64xf32> to vector<128x64xbf16>
    %c0_21 = arith.constant 0 : index
    %c0_22 = arith.constant 0 : index
    %32 = vector.load %arg9[%c0_21, %c0_22] : memref<128x64xbf16, #tpu.memory_space<vmem>>, vector<128x64xbf16>
    tpu.vector_store %arg9[%c0_21, %c0_22], %31 {strides = array<i32>} : memref<128x64xbf16, #tpu.memory_space<vmem>>, vector<128x64xbf16>,
    %33 = arith.truncf %22 : vector<128x32xf32> to vector<128x32xbf16>
    %c0_23 = arith.constant 0 : index
    %c0_24 = arith.constant 0 : index
    %34 = vector.load %arg10[%c0_23, %c0_24] : memref<128x32xbf16, #tpu.memory_space<vmem>>, vector<128x32xbf16>
    tpu.vector_store %arg10[%c0_23, %c0_24], %33 {strides = array<i32>} : memref<128x32xbf16, #tpu.memory_space<vmem>>, vector<128x32xbf16>,
    return
  }
  func.func @transform_0(%arg0: i32) -> (i32, i32) {
    %c0_i32 = arith.constant 0 : i32
    %c0_i32_0 = arith.constant 0 : i32
    %c0_i32_1 = arith.constant 0 : i32
    return %c0_i32, %c0_i32_0 : i32, i32
  }
  func.func @transform_1(%arg0: i32) -> (i32, i32) {
    %c0_i32 = arith.constant 0 : i32
    %c0_i32_0 = arith.constant 0 : i32
    %c0_i32_1 = arith.constant 0 : i32
    return %c0_i32, %c0_i32_0 : i32, i32
  }
  func.func @transform_2(%arg0: i32) -> (i32, i32) {
    %c0_i32 = arith.constant 0 : i32
    %c0_i32_0 = arith.constant 0 : i32
    return %arg0, %c0_i32 : i32, i32
  }
  func.func @transform_3(%arg0: i32) -> (i32, i32) {
    %c0_i32 = arith.constant 0 : i32
    %c0_i32_0 = arith.constant 0 : i32
    return %arg0, %c0_i32 : i32, i32
  }
  func.func @transform_4(%arg0: i32) -> (i32, i32) {
    %c0_i32 = arith.constant 0 : i32
    %c0_i32_0 = arith.constant 0 : i32
    return %arg0, %c0_i32 : i32, i32
  }
  func.func @transform_5(%arg0: i32) -> (i32, i32) {
    %c0_i32 = arith.constant 0 : i32
    %c0_i32_0 = arith.constant 0 : i32
    %c0_i32_1 = arith.constant 0 : i32
    return %c0_i32, %c0_i32_0 : i32, i32
  }
  func.func @transform_6(%arg0: i32) -> (i32, i32) {
    %c0_i32 = arith.constant 0 : i32
    %c0_i32_0 = arith.constant 0 : i32
    %c0_i32_1 = arith.constant 0 : i32
    return %c0_i32, %c0_i32_0 : i32, i32
  }
  func.func @transform_7(%arg0: i32) -> (i32, i32) {
    %c0_i32 = arith.constant 0 : i32
    %c0_i32_0 = arith.constant 0 : i32
    %c0_i32_1 = arith.constant 0 : i32
    return %c0_i32, %c0_i32_0 : i32, i32
  }
  func.func @transform_8(%arg0: i32) -> (i32, i32) {
    %c0_i32 = arith.constant 0 : i32
    %c0_i32_0 = arith.constant 0 : i32
    return %arg0, %c0_i32 : i32, i32
  }
  func.func @transform_9(%arg0: i32) -> (i32, i32) {
    %c0_i32 = arith.constant 0 : i32
    %c0_i32_0 = arith.constant 0 : i32
    return %arg0, %c0_i32 : i32, i32
  }
  func.func @transform_10(%arg0: i32) -> (i32, i32) {
    %c0_i32 = arith.constant 0 : i32
    %c0_i32_0 = arith.constant 0 : i32
    return %arg0, %c0_i32 : i32, i32
  }
}

</mosaic_0001>

<bundles_post_ra>
// kernel: tpu_custom_call.1
= control target key start
LH: loop header
LB: loop body
LE: loop exit
PB: predicated region body
PF: predicated region fallthrough
CT: control target
= control target key end

     0   :  { %s3491_s0 = inlined_call_operand.vmem [shape: bf16[384,64], index: 0, kind: input, shape index: {}]   ;;  %s3492_s1 = inlined_call_operand.vmem [shape: bf16[384,32], index: 1, kind: input, shape index: {}]   ;;  %s3493_s2 = inlined_call_operand.vmem [shape: bf16[384,384], index: 2, kind: input, shape index: {}]   ;;  %s3494_s3 = inlined_call_operand.hbm [shape: bf16[384,384], index: 3, kind: input, shape index: {}]   ;;  %s3495_s4 = inlined_call_operand.vmem [shape: f32[384,1], index: 4, kind: input, shape index: {}]   ;;  %s3496_s5 = inlined_call_operand.vmem [shape: f32[1,64], index: 5, kind: input, shape index: {}]   ;;  %s3497_s6 = inlined_call_operand.vmem [shape: f32[1,32], index: 6, kind: input, shape index: {}]   ;;  %s3498_s7 = inlined_call_operand.<no memory space> [shape: f32[1,1], index: 7, kind: input, shape index: {}]   ;;  %s3499_s8 = inlined_call_operand.vmem [shape: bf16[384,64], index: 8, kind: output, shape index: {0}]   ;;  %s3500_s9 = inlined_call_operand.vmem [shape: bf16[384,32], index: 9, kind: output, shape index: {1}]   ;;  %s3501_s10 = inlined_call_operand.hbm [shape: f32[24,64], index: 10, kind: output, shape index: {2}]  }
   0x1   :  { %3504 = sst [smem:[#allocation11_spill]] %s3494_s3 }
   0x2   :  { %16 = sst [smem:[#allocation2]] %s3498_s7 }
   0x3   :  { %17 = vsyncpa [#allocation4], 0 }
   0x4   :  { %19 = vsyncpa [#allocation4 + $0x1], 0 }
   0x5   :  { %20 = vsyncpa [#allocation5], 0 }
   0x6   :  { %22 = vsyncpa [#allocation5 + $0x1], 0  ;;  %s2883_s15 = smov 0   ;;  %s2885_s16 = smov 0  }
   0x7   :  { %s2887_s17 = smov 0   ;;  %s2889_s18 = smov 0  }
   0x8 LB: > { %3505 = sst [smem:[#allocation9_spill]] %s2814_s17  ;;  %s2904_s7 = sadd.s32 4294967295, %s2818_s18   ;;  %s2818_s18 = sphi %s2889_s18, %s3518_s18   ;;  %s2814_s17 = sphi %s2887_s17, %s3515_s17   ;;  %s2810_s16 = sphi %s2885_s16, %s3517_s16   ;;  %s2806_s15 = sphi %s2883_s15, %s3516_s15  }
   0x9   : > { %s2149_s19 = sadd.s32 4294967294, %s2818_s18   ;;  %s2908_s20 = sadd.s32 1, %s2818_s18  }
   0xa   : > { %s103_s21 = sadd.s32 1, %s2814_s17  ;;  %s100_s22 = ssub.s32 %s2818_s18, %s2908_s20 }
   0xb   : > { %p110_p0 = scmp.ne.s32.totalorder %s2814_s17, %s2810_s16  ;;  %p101_p1 = scmp.eq.s32.totalorder %s100_s22, 0 }
   0xc   : > { %p111_p2 = scmp.eq.s32.totalorder %s2818_s18, 0  ;;  %p116_p3 = scmp.ne.s32.totalorder %s2810_s16, %s2806_s15 }
   0xd   : > { %p117_p4 = scmp.eq.s32.totalorder %s2904_s7, 0  ;;  %p281_p7 = scmp.eq.s32.totalorder %s2904_s7, 2 }
   0xe   : > { %s2920_s23 = scalar_select %p101_p1, %s2814_s17, %s103_s21  }
   0xf   : > { %p112_p5 = por %p111_p2, %p110_p0  ;;  %p2922_p6 = por %p117_p4, %p116_p3 }
  0x10   : > { %3506 = sst [smem:[#allocation10_spill]] %s2920_s23  ;;  %p287_p8 = scmp.eq.s32.totalorder %s2149_s19, 2 }
  0x11   : > { %p2571_p9 = scmp.lt.s32.totalorder %s2818_s18, 3  ;;  %p2928_p10 = por %p281_p7, %p110_p0 }
  0x12   : > { %p2932_p11 = por %p287_p8, %p116_p3  ;;  %s332_s27 = sand.u32 1, %s2814_s17  }
  0x13   : > { %s3508_s25 = scalar_select %p2928_p10, 1, 0 }
  0x14   : > { %s3509_s26 = scalar_select %p2932_p11, 1, 0 }
  0x15   : > { %s2556_s28 = smul.u32 3072, %s2818_s18  ;;  %s3510_s3 = sld [smem:[#allocation11_spill]] }
  0x16   : > { %s2555_s29 = smul.u32 192, %s332_s27  ;;  %p2943_p12 = pnand %p2571_p9, %p112_p5 }
  0x17   : > { %s2949_s21 = scalar_lea.sflag [#allocation4], %s332_s27 }
  0x18   : > { %s336_s14 = scalar_lea.vmem [#allocation3], %s2555_s29  ;;  %p2724_p0 = pneg %p2943_p12 }
  0x19   : > { %s344_s19 = sshll.u32 %s336_s14, 4  ;;  %s2947_s19 = int_to_ptr.vmem [resolvable:$true] %s344_s19 }
  0x1b   : > { %s2941_s12 = scalar_lea.hbm %s3510_s3, %s2556_s28  ;;  %s2727_s11 = scalar_lea.hbm %s3510_s3, 9216 }
  0x1c   : > { %s2722_s22 = scalar_lea.hbm %s2941_s12, 3072  ;;  %p2728_p3 = scmp.lt.u32.totalorder %s2941_s12, %s3510_s3 }
  0x1d   : > { %p2723_p13 = scmp.ne.s32.totalorder %s2941_s12, %s2722_s22  ;;  %p2729_p4 = scmp.lt.u32.totalorder %s2727_s11, %s2722_s22 }
  0x1e   : > { %p2731_p7 = scmp.lt.u32.totalorder %s2722_s22, %s2941_s12 }
  0x1f   : > { %p2725_p1 = pnand %p2724_p0, %p2723_p13  ;;  %p2730_p5 = por %p2729_p4, %p2728_p3 }
  0x21   : > { %p2726_p2 = pneg %p2725_p1  ;;  %p2732_p8 = por %p2731_p7, %p2730_p5 }
  0x23   : > { %p2733_p9 = pnand %p2732_p8, %p2726_p2 }
  0x25   : > { %2736 = shalt.err (!%p2733_p9)
}
  0x26   : > { %s2737_s27 = scalar_lea.vmem %s2947_s19, 3072  ;;  %s2820_s29 = smov [#allocation3]  }
  0x27   : > { %p2738_p13 = scmp.ne.s32.totalorder %s2947_s19, %s2737_s27  ;;  %s2742_s14 = sshll.u32 %s2820_s29, 4  ;;  %s2743_s14 = int_to_ptr.vmem [resolvable:$false] %s2742_s14 }
  0x28   : > { %s2744_s17 = scalar_lea.vmem %s2743_s14, 6144  ;;  %p2745_p10 = scmp.lt.s32.totalorder %s2947_s19, %s2743_s14 }
  0x29   : > { %p2740_p1 = pnand %p2738_p13, %p2724_p0  ;;  %p2746_p3 = scmp.lt.s32.totalorder %s2744_s17, %s2737_s27 }
  0x2b   : > { %p2741_p11 = pneg %p2740_p1  ;;  %p2747_p4 = por %p2746_p3, %p2745_p10 }
  0x2d   : > { %p2748_p5 = pnand %p2747_p4, %p2741_p11 }
  0x2f   : > { %2751 = shalt.err (!%p2748_p5)
}
  0x30   : > { %s2821_s23 = smov 192   ;;  %s2822_s22 = smov 12  }
  0x31   : > { %2566 = dma.hbm_to_vmem [thread:$0]  (!%p2943_p12), %s2941_s12, 3072, %s2947_s19, %s2949_s21, %s2821_s23, %s2821_s23, %s2822_s22  }
  0x32   : > { %p2155_p0 = scmp.ge.s32.totalorder %s2818_s18, 1  ;;  %p361_p2 = scmp.lt.s32.totalorder %s2818_s18, 4 }
  0x34   : > { %p362_p7 = pnand %p2155_p0, %p361_p2 }
  0x35   : > { %s2980_s28 = sand.u32 (!%p362_p7), 1, %s2810_s16  }
  0x36   : > { %365 = sbr.rel (%p362_p7) target bundleno = 423 (0x1a7), region = 52  ;;  %s368_s11 = scalar_lea.sflag (!%p362_p7), [#allocation4], %s2980_s28 }
  0x37   : > { %s2557_s30 = smul.u32 (!%p362_p7), 192, %s2980_s28 }
  0x39   : > { %s2984_s27 = scalar_lea.vmem (!%p362_p7), [#allocation3], %s2557_s30 }
  0x3d   : > { %2797 = dma.done.wait (%p2922_p6), %s368_s11, 3072  }
  0x3e   : > { %2799 = vsyncadd (%p2922_p6), %s368_s11, 4294964224  ;;  %v2823_v0 = vmov 0   ;;  %v2610_v1 = vld [vmem:[%s3491_s0 + $0x40] sm:$0xff]   ;;  %v2613_v4 = vld [vmem:[%s3491_s0 + $0x48] sm:$0xff]   ;;  %s2157_s29 = sshll.u32 %s2904_s7, 4  ;;  %vm1875_vm1 = vcmask 519168  }
  0x3f   : > { %2608 = vset.pattern.permute.xlu0 %v2823_v0  ;;  %2609 = vset.pattern.permute.xlu1 %v2823_v0  ;;  %v2611_v2 = vld [vmem:[%s3491_s0 + $0x80] sm:$0xff]   ;;  %v2614_v5 = vld [vmem:[%s3491_s0 + $0x88] sm:$0xff]   ;;  %v2616_v7 = vld [vmem:[%s3491_s0 + $0x50] sm:$0xff]   ;;  %p430_p6 = scmp.lt.s32.totalorder %s2157_s29, 47  ;;  %vm1772_vm3 = vcmask 523264   ;;  %p3512_p11 = scmp.ne.s32.totalorder %s3508_s25, 0 }
  0x40   : > { %2331 = vmatprep.subr.bf16.mxu0 %v2610_v1  ;;  %v2612_v3 = vld [vmem:[%s3491_s0] sm:$0xff]   ;;  %2491 = vmatprep.subr.bf16.mxu1 %v2611_v2  ;;  %v2615_v6 = vld [vmem:[%s3491_s0 + $0x8] sm:$0xff]   ;;  %v2617_v8 = vld [vmem:[%s3491_s0 + $0x90] sm:$0xff]  }
  0x41   : > { %2332 = vmatpush3.bf16.msra.mxu0 %v2612_v3  ;;  %2492 = vmatpush3.bf16.msra.mxu1 %v2611_v2  ;;  %v2618_v9 = vld [vmem:[%s3491_s0 + $0x10] sm:$0xff]   ;;  %v2619_v10 = vld [vmem:[%s3491_s0 + $0x58] sm:$0xff]   ;;  %v2622_v13 = vld [vmem:[%s3491_s0 + $0x60] sm:$0xff]   ;;  %s3520_s29 = smov (!%p430_p6, %s2157_s29), 47 }
  0x42   : > { %2333 = vmatprep.subr.bf16.mxu0 %v2613_v4  ;;  %2493 = vmatprep.subr.bf16.mxu1 %v2614_v5  ;;  %v2620_v11 = vld [vmem:[%s3491_s0 + $0x98] sm:$0xff]   ;;  %v2623_v14 = vld [vmem:[%s3491_s0 + $0xa0] sm:$0xff]   ;;  %v2625_v16 = vld [vmem:[%s3491_s0 + $0x68] sm:$0xff]   ;;  %s2558_s12 = smul.u32 12, %s3520_s29  ;;  %s2160_s30 = sshll.u32 %s3520_s29, 3 }
  0x43   : > { %v2621_v12 = vld [vmem:[%s3491_s0 + $0x18] sm:$0xff]   ;;  %v2624_v15 = vld [vmem:[%s3491_s0 + $0x20] sm:$0xff]   ;;  %v2626_v17 = vld [vmem:[%s3491_s0 + $0xa8] sm:$0xff]   ;;  %s3177_s21 = scalar_lea.vmem %s3495_s4, %s2160_s30 }
  0x44   : > { %v2627_v18 = vld [vmem:[%s3491_s0 + $0x28] sm:$0xff]   ;;  %v2628_v19 = vld [vmem:[%s3491_s0 + $0x70] sm:$0xff]   ;;  %s3060_s13 = scalar_lea.vmem %s3493_s2, %s2558_s12  ;;  %v2631_v22 = vld [vmem:[%s3491_s0 + $0x78] sm:$0xff]   ;;  %s1984_s12 = scalar_lea.sflag [#allocation5], %s2980_s28 }
  0x45   : > { %2334 = vmatpush3.bf16.msra.mxu0 %v2615_v6  ;;  %2494 = vmatpush3.bf16.msra.mxu1 %v2614_v5  ;;  %v2629_v20 = vld [vmem:[%s3491_s0 + $0xb0] sm:$0xff]   ;;  %v2632_v23 = vld [vmem:[%s3491_s0 + $0xb8] sm:$0xff]   ;;  %v2634_v27 = vld [vmem:[%s3060_s13] ss:$12 sps:$4 sm:$0xff]  }
  0x46   : > { %2335 = vmatprep.subr.bf16.mxu0 %v2616_v7  ;;  %2495 = vmatprep.subr.bf16.mxu1 %v2617_v8  ;;  %v2630_v21 = vld [vmem:[%s3491_s0 + $0x30] sm:$0xff]   ;;  %v2633_v26 = vld [vmem:[%s3491_s0 + $0x38] sm:$0xff]   ;;  %v2638_v28 = vld [vmem:[%s3060_s13 + $0x20] ss:$12 sps:$4 sm:$0xff]  }
  0x47   : > { %v2636_v24 = vld [vmem:[%s3060_s13 + $0x4] ss:$12 sps:$4 sm:$0xff]   ;;  %v2637_v25 = vld [vmem:[%s3060_s13 + $0x8] ss:$12 sps:$4 sm:$0xff]   ;;  %v2651_v41 = vld [vmem:[%s3492_s1 + $0x58] sm:$0xff]  }
  0x48   : > { %848 = vmatprep.mubr.bf16.mxu0 %v2636_v24  ;;  %v2639_v29 = vld [vmem:[%s3492_s1 + $0x40] sm:$0xff]   ;;  %2507 = vmatprep.mubr.bf16.mxu1 %v2637_v25  ;;  %v2641_v32 = vld [vmem:[%s3492_s1 + $0x48] sm:$0xff]   ;;  %v2648_v37 = vld [vmem:[%s3060_s13 + $0x50] ss:$12 sps:$4 sm:$0xff]  }
  0x49   : > { %2336 = vmatpush3.bf16.msra.mxu0 %v2618_v9  ;;  %2496 = vmatpush3.bf16.msra.mxu1 %v2617_v8  ;;  %v2640_v30 = vld [vmem:[%s3492_s1] sm:$0xff]   ;;  %v2644_v33 = vld [vmem:[%s3060_s13 + $0x1c] ss:$12 sps:$4 sm:$0xff]   ;;  %v2649_v38 = vld [vmem:[%s3492_s1 + $0x50] sm:$0xff]  }
  0x4a   : > { %2337 = vmatprep.subr.bf16.mxu0 %v2619_v10  ;;  %2497 = vmatprep.subr.bf16.mxu1 %v2620_v11  ;;  %v2642_v31 = vld [vmem:[%s3492_s1 + $0x80] sm:$0xff]   ;;  %v2643_v35 = vld [vmem:[%s3492_s1 + $0x8] sm:$0xff]   ;;  %v2650_v39 = vld [vmem:[%s3492_s1 + $0x10] sm:$0xff]  }
  0x4b   : > { %v2646_v34 = vld [vmem:[%s3060_s13 + $0x38] ss:$12 sps:$4 sm:$0xff]   ;;  %v2652_v40 = vld [vmem:[%s3492_s1 + $0x88] sm:$0xff]   ;;  %v2654_v42 = vld [vmem:[%s3060_s13 + $0x34] ss:$12 sps:$4 sm:$0xff]  }
  0x4c   : > { %v2647_v36 = vld [vmem:[%s3060_s13 + $0x18] ss:$12 sps:$4 sm:$0xff]   ;;  %v2656_v43 = vld [vmem:[%s3060_s13 + $0x68] ss:$12 sps:$4 sm:$0xff]   ;;  %v2657_v45 = vld [vmem:[%s3060_s13 + $0x30] ss:$12 sps:$4 sm:$0xff]  }
  0x4d   : > { %2338 = vmatpush3.bf16.msra.mxu0 %v2621_v12  ;;  %2498 = vmatpush3.bf16.msra.mxu1 %v2620_v11  ;;  %v2653_v44 = vld [vmem:[%s3492_s1 + $0x18] sm:$0xff]   ;;  %v2658_v46 = vld [vmem:[%s3060_s13 + $0x80] ss:$12 sps:$4 sm:$0xff]   ;;  %v2662_v49 = vld [vmem:[%s3492_s1 + $0x90] sm:$0xff]  }
  0x4e   : > { %2339 = vmatprep.subr.bf16.mxu0 %v2622_v13  ;;  %2499 = vmatprep.subr.bf16.mxu1 %v2623_v14  ;;  %v2659_v47 = vld [vmem:[%s3492_s1 + $0x60] sm:$0xff]   ;;  %v2661_v50 = vld [vmem:[%s3492_s1 + $0x68] sm:$0xff]   ;;  %v2669_v55 = vld [vmem:[%s3492_s1 + $0x70] sm:$0xff]  }
  0x4f   : > { %v2660_v48 = vld [vmem:[%s3492_s1 + $0x20] sm:$0xff]   ;;  %v2664_v51 = vld [vmem:[%s3060_s13 + $0x4c] ss:$12 sps:$4 sm:$0xff]   ;;  %v2667_v54 = vld [vmem:[%s3060_s13 + $0x48] ss:$12 sps:$4 sm:$0xff]  }
  0x50   : > { %v2666_v52 = vld [vmem:[%s3060_s13 + $0x98] ss:$12 sps:$4 sm:$0xff]   ;;  %v2663_v53 = vld [vmem:[%s3492_s1 + $0x28] sm:$0xff]   ;;  %v2668_v56 = vld [vmem:[%s3060_s13 + $0xb0] ss:$12 sps:$4 sm:$0xff]  }
  0x51   : > { %2340 = vmatpush3.bf16.msra.mxu0 %v2624_v15  ;;  %2500 = vmatpush3.bf16.msra.mxu1 %v2623_v14  ;;  %v2670_v57 = vld [vmem:[%s3492_s1 + $0x30] sm:$0xff]   ;;  %v2672_v58 = vld [vmem:[%s3492_s1 + $0x98] sm:$0xff]   ;;  %v2680_v63 = vld [vmem:[%s3492_s1 + $0xa0] sm:$0xff]  }
  0x52   : > { %2341 = vmatprep.subr.bf16.mxu0 %v2625_v16  ;;  %2501 = vmatprep.subr.bf16.mxu1 %v2626_v17  ;;  %v2671_v59 = vld [vmem:[%s3492_s1 + $0x78] sm:$0xff]   ;;  %v2674_v60 = vld [vmem:[%s3060_s13 + $0x64] ss:$12 sps:$4 sm:$0xff]   ;;  %v2676_v0 = vld [vmem:[%s2984_s27] ss:$12 sps:$4 sm:$0xff]  }
  0x53   : > { %v2673_v61 = vld [vmem:[%s3492_s1 + $0x38] sm:$0xff]   ;;  %v2678_v62 = vld [vmem:[%s2984_s27 + $0x4] ss:$12 sps:$4 sm:$0xff]   ;;  %v2679_v1 = vld [vmem:[%s3060_s13 + $0x60] ss:$12 sps:$4 sm:$0xff]  }
  0x54   : > { %v2681_v2 = vld [vmem:[%s3060_s13 + $0x7c] ss:$12 sps:$4 sm:$0xff]   ;;  %v2694_v5 = vld [vmem:[%s3492_s1 + $0xb0] sm:$0xff]   ;;  %v2685_v6 = vld [vmem:[%s3060_s13 + $0x78] ss:$12 sps:$4 sm:$0xff]  }
  0x55   : > { %2342 = vmatpush3.bf16.msra.mxu0 %v2627_v18  ;;  %2502 = vmatpush3.bf16.msra.mxu1 %v2626_v17  ;;  %v2683_v3 = vld [vmem:[%s2984_s27 + $0x1c] ss:$12 sps:$4 sm:$0xff]   ;;  %v2686_v7 = vld [vmem:[%s2984_s27 + $0x18] ss:$12 sps:$4 sm:$0xff]   ;;  %v2688_v8 = vld [vmem:[%s3060_s13 + $0x94] ss:$12 sps:$4 sm:$0xff]  }
  0x56   : > { %2343 = vmatprep.subr.bf16.mxu0 %v2628_v19  ;;  %2503 = vmatprep.subr.bf16.mxu1 %v2629_v20  ;;  %v2687_v4 = vld [vmem:[%s3492_s1 + $0xa8] sm:$0xff]   ;;  %v2701_v9 = vld [vmem:[%s3492_s1 + $0xb8] sm:$0xff]   ;;  %v2690_v10 = vld [vmem:[%s2984_s27 + $0x34] ss:$12 sps:$4 sm:$0xff]  }
  0x57   : > { %v2692_v11 = vld [vmem:[%s3060_s13 + $0x90] ss:$12 sps:$4 sm:$0xff]   ;;  %v2695_v13 = vld [vmem:[%s3060_s13 + $0xac] ss:$12 sps:$4 sm:$0xff]   ;;  %v1660_v15 = vld [vmem:[%s3177_s21] sm:$0xff] }
  0x58   : > { %v2693_v12 = vld [vmem:[%s2984_s27 + $0x30] ss:$12 sps:$4 sm:$0xff]   ;;  %v2697_v14 = vld [vmem:[%s2984_s27 + $0x4c] ss:$12 sps:$4 sm:$0xff]   ;;  %1678 = vperm.xlu0 %2608, %v1660_v15   ;;  %v2699_v17 = vld [vmem:[%s3060_s13 + $0xa8] ss:$12 sps:$4 sm:$0xff]  }
  0x59   : > { %2344 = vmatpush3.bf16.msra.mxu0 %v2630_v21  ;;  %2504 = vmatpush3.bf16.msra.mxu1 %v2629_v20  ;;  %v1662_v16 = vld [vmem:[%s3177_s21 + $0x10] sm:$0xff]  ;;  %v1661_v19 = vld [vmem:[%s3177_s21 + $0x8] sm:$0xff]  ;;  %s456_s13 = sld [smem:[#allocation2]] }
  0x5a   : > { %2345 = vmatprep.subr.bf16.mxu0 %v2631_v22  ;;  %2505 = vmatprep.subr.bf16.mxu1 %v2632_v23  ;;  %v2700_v18 = vld [vmem:[%s2984_s27 + $0x48] ss:$12 sps:$4 sm:$0xff]   ;;  %v2702_v20 = vld [vmem:[%s2984_s27 + $0x64] ss:$12 sps:$4 sm:$0xff]   ;;  %v1663_v22 = vld [vmem:[%s3177_s21 + $0x18] sm:$0xff] }
  0x5b   : > { %1688 = vperm.xlu1 %2609, %v1662_v16   ;;  %v2704_v21 = vld [vmem:[%s2984_s27 + $0x8] ss:$12 sps:$4 sm:$0xff]   ;;  %v2705_v25 = vld [vmem:[%s2984_s27 + $0x60] ss:$12 sps:$4 sm:$0xff]  }
  0x5c   : > { %1683 = vperm.xlu0 %2608, %v1661_v19   ;;  %v1665_v24 = vld [vmem:[%s3177_s21 + $0x28] sm:$0xff] }
  0x5d   : > { %2346 = vmatpush3.bf16.msra.mxu0 %v2633_v26  ;;  %2506 = vmatpush3.bf16.msra.mxu1 %v2632_v23  ;;  %v1664_v23 = vld [vmem:[%s3177_s21 + $0x20] sm:$0xff] }
  0x5e   : > { %2411 = vmatprep.subr.bf16.mxu1 %v2639_v29  ;;  %2523 = vmatprep.subr.bf16.mxu0 %v2642_v31  ;;  %v2706_v26 = vld [vmem:[%s2984_s27 + $0x20] ss:$12 sps:$4 sm:$0xff]   ;;  %v2709_v29 = vld [vmem:[%s2984_s27 + $0x38] ss:$12 sps:$4 sm:$0xff]  }
  0x5f   : > { %1693 = vperm.xlu1 %2609, %v1663_v22  }
  0x60   : > { %849 = vmatmul.mubr.bf16.vlgmr.msra.gmra.mrb[0].mxu0 %v2634_v27  ;;  %2508 = vmatmul.mubr.bf16.vlgmr.msra.gmra.mrb[0].mxu1 %v2638_v28  ;;  %v1666_v27 = vld [vmem:[%s3177_s21 + $0x30] sm:$0xff]  ;;  %v2707_v28 = vld [vmem:[%s2984_s27 + $0x7c] ss:$12 sps:$4 sm:$0xff]  }
  0x61   : > { %2412 = vmatpush3.bf16.msra.mxu1 %v2640_v30  ;;  %2524 = vmatpush3.bf16.msra.mxu0 %v2642_v31  ;;  %v1667_v30 = vld [vmem:[%s3177_s21 + $0x38] sm:$0xff]  ;;  %v1668_v31 = vld [vmem:[%s3177_s21 + $0x40] sm:$0xff] }
  0x62   : > { %2413 = vmatprep.subr.bf16.mxu1 %v2641_v32  ;;  %856 = vmatprep.mubr.bf16.mxu0 %v2644_v33  ;;  %v1669_v32 = vld [vmem:[%s3177_s21 + $0x48] sm:$0xff]  ;;  %v2710_v33 = vld [vmem:[%s2984_s27 + $0x78] ss:$12 sps:$4 sm:$0xff]  }
  0x63   : > { %2511 = vmatprep.mubr.bf16.mxu1 %v2646_v34  ;;  %2525 = vmatprep.subr.bf16.mxu0 %v2652_v40  ;;  %v2711_v34 = vld [vmem:[%s2984_s27 + $0x50] ss:$12 sps:$4 sm:$0xff]  }
  0x64   : > { %1698 = vperm.xlu0 %2608, %v1664_v23   ;;  %1703 = vperm.xlu1 %2609, %v1665_v24  }
  0x65   : > { %2414 = vmatpush3.bf16.msra.mxu1 %v2643_v35  ;;  %2526 = vmatpush3.bf16.msra.mxu0 %v2652_v40  ;;  %v1670_v35 = vld [vmem:[%s3177_s21 + $0x50] sm:$0xff]  ;;  %v1673_v40 = vld [vmem:[%s3177_s21 + $0x68] sm:$0xff] }
  0x66   : > { %2415 = vmatprep.subr.bf16.mxu1 %v2649_v38  ;;  %2527 = vmatprep.subr.bf16.mxu0 %v2662_v49  ;;  %v1671_v38 = vld [vmem:[%s3177_s21 + $0x58] sm:$0xff] }
  0x68   : > { %857 = vmatmul.mubr.bf16.gmra.mrb[4].mxu0 %v2647_v36  ;;  %2512 = vmatmul.mubr.bf16.gmra.mrb[4].mxu1 %v2648_v37  ;;  %v2712_v36 = vld [vmem:[%s2984_s27 + $0x94] ss:$12 sps:$4 sm:$0xff]  }
  0x69   : > { %2416 = vmatpush3.bf16.msra.mxu1 %v2650_v39  ;;  %864 = vmatprep.mubr.bf16.mxu0 %v2654_v42  ;;  %v2714_v37 = vld [vmem:[%s2984_s27 + $0x68] ss:$12 sps:$4 sm:$0xff]   ;;  %v1672_v39 = vld [vmem:[%s3177_s21 + $0x60] sm:$0xff] }
  0x6a   : > { %2417 = vmatprep.subr.bf16.mxu1 %v2651_v41  ;;  %2515 = vmatprep.mubr.bf16.mxu1 %v2656_v43  ;;  %v2715_v41 = vld [vmem:[%s2984_s27 + $0x90] ss:$12 sps:$4 sm:$0xff]   ;;  %v2716_v42 = vld [vmem:[%s2984_s27 + $0x80] ss:$12 sps:$4 sm:$0xff]  }
  0x6b   : > { %2528 = vmatpush3.bf16.msra.mxu0 %v2662_v49  ;;  %1708 = vperm.xlu0 %2608, %v1666_v27   ;;  %v1674_v43 = vld [vmem:[%s3177_s21 + $0x70] sm:$0xff] }
  0x6c   : > { %2529 = vmatprep.subr.bf16.mxu0 %v2672_v58  ;;  %1713 = vperm.xlu1 %2609, %v1667_v30  }
  0x6d   : > { %2418 = vmatpush3.bf16.msra.mxu1 %v2653_v44  ;;  %v2717_v44 = vld [vmem:[%s2984_s27 + $0xac] ss:$12 sps:$4 sm:$0xff]  }
  0x6e   : > { %2419 = vmatprep.subr.bf16.mxu1 %v2659_v47  ;;  %v2720_v47 = vld [vmem:[%s2984_s27 + $0xa8] ss:$12 sps:$4 sm:$0xff]  }
  0x6f   : > { %2530 = vmatpush3.bf16.msra.mxu0 %v2672_v58  ;;  %1718 = vperm.xlu0 %2608, %v1668_v31  }
  0x70   : > { %865 = vmatmul.mubr.bf16.gmra.mrb[8].mxu0 %v2657_v45  ;;  %2516 = vmatmul.mubr.bf16.gmra.mrb[8].mxu1 %v2658_v46  ;;  %v2719_v45 = vld [vmem:[%s2984_s27 + $0x98] ss:$12 sps:$4 sm:$0xff]  }
  0x71   : > { %2420 = vmatpush3.bf16.msra.mxu1 %v2660_v48  ;;  %872 = vmatprep.mubr.bf16.mxu0 %v2664_v51  ;;  %v1675_v46 = vld [vmem:[%s3177_s21 + $0x78] sm:$0xff]  ;;  %s2296_s21 = sshll.u32 %s2904_s7, 7 }
  0x72   : > { %2421 = vmatprep.subr.bf16.mxu1 %v2661_v50  ;;  %2519 = vmatprep.mubr.bf16.mxu1 %v2666_v52  ;;  %v2721_v48 = vld [vmem:[%s2984_s27 + $0xb0] ss:$12 sps:$4 sm:$0xff]   ;;  %s2162_s27 = sshll.u32 %s3520_s29, 2  ;;  %s2156_s29 = sshll.u32 %s2980_s28, 3 }
  0x73   : > { %2531 = vmatprep.subr.bf16.mxu0 %v2680_v63  ;;  %1723 = vperm.xlu1 %2609, %v1669_v32   ;;  %s3232_s17 = scalar_lea.vmem %s3499_s8, %s2162_s27  ;;  %s3372_s19 = scalar_lea.vmem %s3500_s9, %s2162_s27 }
  0x74   : > { %2532 = vmatpush3.bf16.msra.mxu0 %v2680_v63  ;;  %1728 = vperm.xlu0 %2608, %v1670_v35   ;;  %s3427_s27 = scalar_lea.hbm %s3501_s10, %s2296_s21 }
  0x75   : > { %2422 = vmatpush3.bf16.msra.mxu1 %v2663_v53  ;;  %2533 = vmatprep.subr.bf16.mxu0 %v2687_v4  ;;  %v3216_v53 = vld [vmem:[%s3496_s5] ss:$0 sm:$0xff] }
  0x76   : > { %2423 = vmatprep.subr.bf16.mxu1 %v2669_v55 }
  0x77   : > { %1733 = vperm.xlu1 %2609, %v1671_v38  }
  0x78   : > { %873 = vmatmul.mubr.bf16.gmra.mrb[12].mxu0 %v2667_v54  ;;  %2520 = vmatmul.mubr.bf16.gmra.mrb[12].mxu1 %v2668_v56 }
  0x79   : > { %2424 = vmatpush3.bf16.msra.mxu1 %v2670_v57  ;;  %880 = vmatprep.mubr.bf16.mxu0 %v2674_v60 }
  0x7a   : > { %2425 = vmatprep.subr.bf16.mxu1 %v2671_v59  ;;  %1450 = vmatprep.mubr.bf16.mxu1 %v2678_v62  ;;  %v3219_v62 = vstv %s456_s13  ;;  %s428_s13 = scalar_lea.vmem [#allocation6], %s2156_s29 }
  0x7b   : > { %2534 = vmatpush3.bf16.msra.mxu0 %v2687_v4  ;;  %1738 = vperm.xlu0 %2608, %v1672_v39   ;;  %s2005_s14 = sshll.u32 %s428_s13, 4  ;;  %s3429_s14 = int_to_ptr.vmem [resolvable:$true] %s2005_s14 }
  0x7c   : > { %2535 = vmatprep.subr.bf16.mxu0 %v2694_v5  ;;  %1743 = vperm.xlu1 %2609, %v1673_v40   ;;  %s2752_s24 = scalar_lea.vmem %s3429_s14, 128 }
  0x7d   : > { %2426 = vmatpush3.bf16.msra.mxu1 %v2673_v61  ;;  %p2753_p10 = scmp.ne.s32.totalorder %s3429_s14, %s2752_s24 }
  0x7f   : > { %2536 = vmatpush3.bf16.msra.mxu0 %v2694_v5  ;;  %1748 = vperm.xlu0 %2608, %v1674_v43   ;;  %p2754_p12 = pnand %p2753_p10, %p3512_p11 }
  0x80   : > { %881 = vmatmul.mubr.bf16.gmra.mrb[16].mxu0 %v2679_v1  ;;  %1451 = vmatmul.mubr.bf16.vlgmr.msra.gmra.mrb[16].mxu1 %v2676_v0 }
  0x81   : > { %888 = vmatprep.mubr.bf16.mxu0 %v2681_v2  ;;  %1458 = vmatprep.mubr.bf16.mxu1 %v2683_v3  ;;  %p2755_p8 = pneg %p2754_p12 }
  0x82   : > { %2537 = vmatprep.subr.bf16.mxu0 %v2701_v9  ;;  %1753 = vperm.xlu1 %2609, %v1675_v46  }
  0x83   : > { %2538 = vmatpush3.bf16.msra.mxu0 %v2701_v9 }
  0x88   : > { %889 = vmatmul.mubr.bf16.gmra.mrb[20].mxu0 %v2685_v6  ;;  %1459 = vmatmul.mubr.bf16.gmra.mrb[20].mxu1 %v2686_v7 }
  0x89   : > { %896 = vmatprep.mubr.bf16.mxu0 %v2688_v8  ;;  %1466 = vmatprep.mubr.bf16.mxu1 %v2690_v10 }
  0x90   : > { %897 = vmatmul.mubr.bf16.gmra.mrb[24].mxu0 %v2692_v11  ;;  %1467 = vmatmul.mubr.bf16.gmra.mrb[24].mxu1 %v2693_v12 }
  0x91   : > { %904 = vmatprep.mubr.bf16.mxu0 %v2695_v13  ;;  %1474 = vmatprep.mubr.bf16.mxu1 %v2697_v14 }
  0x98   : > { %905 = vmatmul.mubr.bf16.gmra.mrb[28].mxu0 %v2699_v17  ;;  %1475 = vmatmul.mubr.bf16.gmra.mrb[28].mxu1 %v2700_v18 }
  0x99   : > { %1482 = vmatprep.mubr.bf16.mxu1 %v2702_v20  ;;  %2539 = vmatprep.mubr.bf16.mxu0 %v2704_v21 }
  0xa0   : > { %1483 = vmatmul.mubr.bf16.gmra.mrb[32].mxu1 %v2705_v25  ;;  %2540 = vmatmul.mubr.bf16.vlgmr.msra.gmra.mrb[32].mxu0 %v2706_v26 }
  0xa1   : > { %1490 = vmatprep.mubr.bf16.mxu1 %v2707_v28  ;;  %2543 = vmatprep.mubr.bf16.mxu0 %v2709_v29 }
  0xa8   : > { %1491 = vmatmul.mubr.bf16.gmra.mrb[36].mxu1 %v2710_v33  ;;  %2544 = vmatmul.mubr.bf16.gmra.mrb[36].mxu0 %v2711_v34 }
  0xa9   : > { %1498 = vmatprep.mubr.bf16.mxu1 %v2712_v36  ;;  %2547 = vmatprep.mubr.bf16.mxu0 %v2714_v37 }
  0xb0   : > { %1499 = vmatmul.mubr.bf16.gmra.mrb[40].mxu1 %v2715_v41  ;;  %2548 = vmatmul.mubr.bf16.gmra.mrb[40].mxu0 %v2716_v42 }
  0xb1   : > { %1506 = vmatprep.mubr.bf16.mxu1 %v2717_v44  ;;  %2551 = vmatprep.mubr.bf16.mxu0 %v2719_v45 }
  0xb8   : > { %1507 = vmatmul.mubr.bf16.gmra.mrb[44].mxu1 %v2720_v47  ;;  %2552 = vmatmul.mubr.bf16.gmra.mrb[44].mxu0 %v2721_v48 }
  0xd7   : > { %v1679_v49 = vpop.permute.xlu0 %1678 }
  0xda   : > { %v1689_v2 = vpop.permute.xlu1 %1688 }
  0xdb   : > { %v1684_v1 = vpop.permute.xlu0 %1683 }
  0xde   : > { %v1694_v27 = vpop.permute.xlu1 %1693 }
 0x133   : > { %v2347_v50 = vpop.f32.mrb[0].mxu0  ;;  %v2509_v51 = vpop.f32.mrb[0].mxu1 }
 0x134   : > { %v2348_v52 = vpop.f32.mrb[1].mxu0  ;;  %v947_v54 = vpop.f32.mrb[1].mxu1 }
 0x135   : > { %v2349_v55 = vadd.f32 %v2348_v52, %v2347_v50  ;;  %v2350_v56 = vpop.f32.mrb[2].mxu0  ;;  %v2510_v57 = vpop.f32.mrb[2].mxu1 }
 0x136   : > { %v2351_v58 = vpop.f32.mrb[3].mxu0  ;;  %v950_v59 = vpop.f32.mrb[3].mxu1 }
 0x137   : > { %v851_v60 = vadd.f32 %v2349_v55, %v3216_v53  ;;  %v2352_v61 = vadd.f32 %v2351_v58, %v2350_v56  ;;  %v1699_v55 = vpop.permute.xlu0 %1698  ;;  %v1704_v56 = vpop.permute.xlu1 %1703 }
 0x139   : > { %v948_v63 = vadd.f32 %v947_v54, %v851_v60  ;;  %v854_v0 = vadd.f32 %v2352_v61, %v3216_v53 }
 0x13b   : > { %v1027_v3 = vmul.f32 %v3219_v62, %v948_v63  ;;  %v951_v4 = vadd.f32 %v950_v59, %v854_v0  ;;  %vm1010_vm0 = vcmp.gt.f32.partialorder %v948_v63, 0.0  ;;  %v2353_v5 = vpop.f32.mrb[4].mxu0  ;;  %v3224_v6 = vpop.f32.mrb[4].mxu1 }
 0x13c   : > { %v2354_v7 = vpop.f32.mrb[5].mxu0  ;;  %v963_v8 = vpop.f32.mrb[5].mxu1 }
 0x13d   : > { %v1028_v9 = vmul.f32 %v3219_v62, %v951_v4  ;;  %v1043_v10 = vsel %vm1010_vm0, %v948_v63, %v1027_v3  ;;  %v2355_v11 = vadd.f32 %v2354_v7, %v2353_v5  ;;  %v2356_v12 = vpop.f32.mrb[6].mxu0  ;;  %v3234_v13 = vpop.f32.mrb[6].mxu1  ;;  %vm1011_vm2 = vcmp.gt.f32.partialorder %v951_v4, 0.0 }
 0x13e   : > { %v1756_v14 = vmul.f32 %v1679_v49, %v1043_v10  ;;  %v2299_v15 = vpack.c.bf16 %v1043_v10, %v1043_v10  ;;  %v2357_v16 = vpop.f32.mrb[7].mxu0  ;;  %v966_v17 = vpop.f32.mrb[7].mxu1  ;;  %vm1956_vm0 = vcmask 257024  }
 0x13f   : > { %v859_v18 = vadd.f32 %v2355_v11, %v3216_v53  ;;  %v2358_v19 = vadd.f32 %v2357_v16, %v2356_v12  ;;  %v1044_v20 = vsel %vm1011_vm2, %v951_v4, %v1028_v9 }
 0x140   : > { %1876 = vst.msk [vmem:[%s3232_s17] sm:$0xf] %vm1875_vm1, %v2299_v15  ;;  %v1757_v21 = vmul.f32 %v1684_v1, %v1044_v20  ;;  %v2300_v22 = vpack.c.bf16 %v1044_v20, %v1044_v20  ;;  %v1773_v25 = vsel %vm1772_vm3, %v1756_v14, 0.0 }
 0x141   : > { %v956_v23 = vadd.f32 %v2509_v51, %v859_v18  ;;  %v862_v24 = vadd.f32 %v2358_v19, %v3216_v53 }
 0x142   : > { %v1774_v26 = vsel %vm1772_vm3, %v1757_v21, 0.0  ;;  %1877 = vst.msk [vmem:[%s3232_s17 + $0x4] sm:$0xf] %vm1875_vm1, %v2300_v22  ;;  %v1709_v22 = vpop.permute.xlu0 %1708 }
 0x143   : > { %v959_v28 = vadd.f32 %v2510_v57, %v862_v24  ;;  %v1775_v29 = vadd.f32 %v1774_v26, %v1773_v25  ;;  %vm1012_vm4 = vcmp.gt.f32.partialorder %v956_v23, 0.0  ;;  %v1029_v30 = vmul.f32 %v3219_v62, %v956_v23  ;;  %v2359_v31 = vpop.f32.mrb[8].mxu0  ;;  %v3245_v32 = vpop.f32.mrb[8].mxu1 }
 0x144   : > { %v2360_v33 = vpop.f32.mrb[9].mxu0  ;;  %v3247_v34 = vpop.f32.mrb[9].mxu1 }
 0x145   : > { %v1045_v35 = vsel %vm1012_vm4, %v956_v23, %v1029_v30  ;;  %v2361_v36 = vadd.f32 %v2360_v33, %v2359_v31  ;;  %v2362_v37 = vpop.f32.mrb[10].mxu0  ;;  %v3249_v38 = vpop.f32.mrb[10].mxu1  ;;  %vm1013_vm5 = vcmp.gt.f32.partialorder %v959_v28, 0.0  ;;  %v1030_v39 = vmul.f32 %v3219_v62, %v959_v28 }
 0x146   : > { %v1758_v40 = vmul.f32 %v1689_v2, %v1045_v35  ;;  %v2301_v41 = vpack.c.bf16 %v1045_v35, %v1045_v35  ;;  %v2363_v42 = vpop.f32.mrb[11].mxu0  ;;  %v3252_v43 = vpop.f32.mrb[11].mxu1 }
 0x147   : > { %v867_v44 = vadd.f32 %v2361_v36, %v3216_v53  ;;  %v2364_v45 = vadd.f32 %v2363_v42, %v2362_v37  ;;  %v1046_v46 = vsel %vm1013_vm5, %v959_v28, %v1030_v39  ;;  %v1714_v23 = vpop.permute.xlu1 %1713 }
 0x148   : > { %v1776_v47 = vsel %vm1772_vm3, %v1758_v40, 0.0  ;;  %1878 = vst.msk [vmem:[%s3232_s17 + $0x8] sm:$0xf] %vm1875_vm1, %v2301_v41  ;;  %v1759_v48 = vmul.f32 %v1694_v27, %v1046_v46  ;;  %v2302_v49 = vpack.c.bf16 %v1046_v46, %v1046_v46 }
 0x149   : > { %v1777_v50 = vadd.f32 %v1776_v47, %v1775_v29  ;;  %v964_v51 = vadd.f32 %v963_v8, %v867_v44  ;;  %v870_v52 = vadd.f32 %v2364_v45, %v3216_v53 }
 0x14a   : > { %v1778_v54 = vsel %vm1772_vm3, %v1759_v48, 0.0  ;;  %1879 = vst.msk [vmem:[%s3232_s17 + $0xc] sm:$0xf] %vm1875_vm1, %v2302_v49 }
 0x14b   : > { %v967_v57 = vadd.f32 %v966_v17, %v870_v52  ;;  %v1779_v58 = vadd.f32 %v1778_v54, %v1777_v50  ;;  %v2365_v59 = vpop.f32.mrb[12].mxu0  ;;  %v3262_v60 = vpop.f32.mrb[12].mxu1  ;;  %vm1014_vm6 = vcmp.gt.f32.partialorder %v964_v51, 0.0  ;;  %v1031_v61 = vmul.f32 %v3219_v62, %v964_v51 }
 0x14c   : > { %v2366_v63 = vpop.f32.mrb[13].mxu0  ;;  %v3265_v0 = vpop.f32.mrb[13].mxu1 }
 0x14d   : > { %v2367_v1 = vadd.f32 %v2366_v63, %v2365_v59  ;;  %v1047_v2 = vsel %vm1014_vm6, %v964_v51, %v1031_v61  ;;  %v2368_v3 = vpop.f32.mrb[14].mxu0  ;;  %v3267_v4 = vpop.f32.mrb[14].mxu1  ;;  %vm1015_vm7 = vcmp.gt.f32.partialorder %v967_v57, 0.0  ;;  %v1032_v5 = vmul.f32 %v3219_v62, %v967_v57 }
 0x14e   : > { %v1760_v7 = vmul.f32 %v1699_v55, %v1047_v2  ;;  %v2303_v8 = vpack.c.bf16 %v1047_v2, %v1047_v2  ;;  %v2369_v9 = vpop.f32.mrb[15].mxu0  ;;  %v3270_v10 = vpop.f32.mrb[15].mxu1 }
 0x14f   : > { %v875_v11 = vadd.f32 %v2367_v1, %v3216_v53  ;;  %v2370_v12 = vadd.f32 %v2369_v9, %v2368_v3  ;;  %v1048_v14 = vsel %vm1015_vm7, %v967_v57, %v1032_v5  ;;  %v1719_v54 = vpop.permute.xlu0 %1718  ;;  %v1724_v55 = vpop.permute.xlu1 %1723 }
 0x150   : > { %v1780_v15 = vsel %vm1772_vm3, %v1760_v7, 0.0  ;;  %1880 = vst.msk [vmem:[%s3232_s17 + $0x10] sm:$0xf] %vm1875_vm1, %v2303_v8  ;;  %v1761_v16 = vmul.f32 %v1704_v56, %v1048_v14  ;;  %v2304_v17 = vpack.c.bf16 %v1048_v14, %v1048_v14 }
 0x151   : > { %v972_v18 = vadd.f32 %v3224_v6, %v875_v11  ;;  %v1781_v19 = vadd.f32 %v1780_v15, %v1779_v58  ;;  %v878_v20 = vadd.f32 %v2370_v12, %v3216_v53 }
 0x152   : > { %v1782_v21 = vsel %vm1772_vm3, %v1761_v16, 0.0  ;;  %1881 = vst.msk [vmem:[%s3232_s17 + $0x14] sm:$0xf] %vm1875_vm1, %v2304_v17 }
 0x153   : > { %v975_v24 = vadd.f32 %v3234_v13, %v878_v20  ;;  %v1783_v25 = vadd.f32 %v1782_v21, %v1781_v19  ;;  %v2371_v26 = vpop.f32.mrb[16].mxu0  ;;  %v2427_v27 = vpop.f32.mrb[16].mxu1  ;;  %vm1016_vm8 = vcmp.gt.f32.partialorder %v972_v18, 0.0  ;;  %v1033_v28 = vmul.f32 %v3219_v62, %v972_v18 }
 0x154   : > { %v2372_v29 = vpop.f32.mrb[17].mxu0  ;;  %v2428_v30 = vpop.f32.mrb[17].mxu1 }
 0x155   : > { %v2373_v6 = vadd.f32 %v2372_v29, %v2371_v26  ;;  %v3283_v31 = vadd.f32 %v2428_v30, %v2427_v27  ;;  %v1049_v33 = vsel %vm1016_vm8, %v972_v18, %v1033_v28  ;;  %v2374_v35 = vpop.f32.mrb[18].mxu0  ;;  %v2430_v36 = vpop.f32.mrb[18].mxu1  ;;  %vm1017_vm9 = vcmp.gt.f32.partialorder %v975_v24, 0.0 }
 0x156   : > { %v1762_v37 = vmul.f32 %v1709_v22, %v1049_v33  ;;  %v2305_v39 = vpack.c.bf16 %v1049_v33, %v1049_v33  ;;  %v2375_v40 = vpop.f32.mrb[19].mxu0  ;;  %v2431_v13 = vpop.f32.mrb[19].mxu1  ;;  %v1034_v41 = vmul.f32 %v3219_v62, %v975_v24 }
 0x157   : > { %v883_v42 = vadd.f32 %v2373_v6, %v3216_v53  ;;  %v2376_v44 = vadd.f32 %v2375_v40, %v2374_v35  ;;  %v3287_v45 = vadd.f32 %v2431_v13, %v2430_v36 }
 0x158   : > { %v1784_v46 = vsel %vm1772_vm3, %v1762_v37, 0.0  ;;  %1882 = vst.msk [vmem:[%s3232_s17 + $0x18] sm:$0xf] %vm1875_vm1, %v2305_v39  ;;  %v1050_v47 = vsel %vm1017_vm9, %v975_v24, %v1034_v41 }
 0x159   : > { %v980_v48 = vadd.f32 %v3247_v34, %v883_v42  ;;  %v1785_v49 = vadd.f32 %v1784_v46, %v1783_v25  ;;  %v886_v50 = vadd.f32 %v2376_v44, %v3216_v53  ;;  %v1763_v51 = vmul.f32 %v1714_v23, %v1050_v47  ;;  %v1729_v25 = vpop.permute.xlu0 %1728  ;;  %v1734_v46 = vpop.permute.xlu1 %1733 }
 0x15a   : > { %v2306_v52 = vpack.c.bf16 %v1050_v47, %v1050_v47 }
 0x15b   : > { %v983_v56 = vadd.f32 %v3252_v43, %v886_v50  ;;  %v1786_v57 = vsel %vm1772_vm3, %v1763_v51, 0.0  ;;  %v2377_v58 = vpop.f32.mrb[20].mxu0  ;;  %v2433_v59 = vpop.f32.mrb[20].mxu1  ;;  %vm1018_vm10 = vcmp.gt.f32.partialorder %v980_v48, 0.0  ;;  %v1035_v61 = vmul.f32 %v3219_v62, %v980_v48 }
 0x15c   : > { %v1787_v63 = vadd.f32 %v1786_v57, %v1785_v49  ;;  %1883 = vst.msk [vmem:[%s3232_s17 + $0x1c] sm:$0xf] %vm1875_vm1, %v2306_v52  ;;  %v2378_v34 = vpop.f32.mrb[21].mxu0  ;;  %v2434_v1 = vpop.f32.mrb[21].mxu1 }
 0x15d   : > { %v1051_v2 = vsel %vm1018_vm10, %v980_v48, %v1035_v61  ;;  %v2379_v3 = vadd.f32 %v2378_v34, %v2377_v58  ;;  %v3299_v5 = vadd.f32 %v2434_v1, %v2433_v59  ;;  %v2380_v7 = vpop.f32.mrb[22].mxu0  ;;  %v2436_v8 = vpop.f32.mrb[22].mxu1  ;;  %vm1019_vm11 = vcmp.gt.f32.partialorder %v983_v56, 0.0 }
 0x15e   : > { %v1764_v43 = vmul.f32 %v1719_v54, %v1051_v2  ;;  %v2307_v9 = vpack.c.bf16 %v1051_v2, %v1051_v2  ;;  %v2381_v11 = vpop.f32.mrb[23].mxu0  ;;  %v2437_v12 = vpop.f32.mrb[23].mxu1  ;;  %v1036_v14 = vmul.f32 %v3219_v62, %v983_v56 }
 0x15f   : > { %v891_v15 = vadd.f32 %v2379_v3, %v3216_v53  ;;  %v2382_v16 = vadd.f32 %v2381_v11, %v2380_v7  ;;  %v3303_v17 = vadd.f32 %v2437_v12, %v2436_v8  ;;  %v1739_v59 = vpop.permute.xlu0 %1738 }
 0x160   : > { %v1788_v18 = vsel %vm1772_vm3, %v1764_v43, 0.0  ;;  %1884 = vst.msk [vmem:[%s3232_s17 + $0x20] sm:$0xf] %vm1875_vm1, %v2307_v9  ;;  %v1052_v19 = vsel %vm1019_vm11, %v983_v56, %v1036_v14 }
 0x161   : > { %v1789_v20 = vadd.f32 %v1788_v18, %v1787_v63  ;;  %v988_v21 = vadd.f32 %v3245_v32, %v891_v15  ;;  %v894_v22 = vadd.f32 %v2382_v16, %v3216_v53  ;;  %v1765_v23 = vmul.f32 %v1724_v55, %v1052_v19 }
 0x162   : > { %v2308_v24 = vpack.c.bf16 %v1052_v19, %v1052_v19 }
 0x163   : > { %v991_v26 = vadd.f32 %v3249_v38, %v894_v22  ;;  %v1790_v27 = vsel %vm1772_vm3, %v1765_v23, 0.0  ;;  %vm1020_vm12 = vcmp.gt.f32.partialorder %v988_v21, 0.0  ;;  %v1037_v28 = vmul.f32 %v3219_v62, %v988_v21  ;;  %v2383_v29 = vpop.f32.mrb[24].mxu0  ;;  %v2439_v30 = vpop.f32.mrb[24].mxu1  ;;  %v3338_v23 = vld [vmem:[%s3497_s6] ss:$0 sm:$0xff] }
 0x164   : > { %v1791_v6 = vadd.f32 %v1790_v27, %v1789_v20  ;;  %1885 = vst.msk [vmem:[%s3232_s17 + $0x24] sm:$0xf] %vm1875_vm1, %v2308_v24  ;;  %v2384_v33 = vpop.f32.mrb[25].mxu0  ;;  %v2440_v35 = vpop.f32.mrb[25].mxu1 }
 0x165   : > { %v1053_v32 = vsel %vm1020_vm12, %v988_v21, %v1037_v28  ;;  %vm1021_vm13 = vcmp.gt.f32.partialorder %v991_v26, 0.0  ;;  %v1038_v36 = vmul.f32 %v3219_v62, %v991_v26  ;;  %v2385_v37 = vadd.f32 %v2384_v33, %v2383_v29  ;;  %v2386_v39 = vpop.f32.mrb[26].mxu0  ;;  %v2442_v38 = vpop.f32.mrb[26].mxu1 }
 0x166   : > { %v1766_v40 = vmul.f32 %v1729_v25, %v1053_v32  ;;  %v2309_v13 = vpack.c.bf16 %v1053_v32, %v1053_v32  ;;  %v3316_v41 = vadd.f32 %v2440_v35, %v2439_v30  ;;  %v2387_v42 = vpop.f32.mrb[27].mxu0  ;;  %v2443_v44 = vpop.f32.mrb[27].mxu1  ;;  %v1461_v33 = vadd.f32 %v3299_v5, %v3338_v23 }
 0x167   : > { %v1054_v47 = vsel %vm1021_vm13, %v991_v26, %v1038_v36  ;;  %v899_v48 = vadd.f32 %v2385_v37, %v3216_v53  ;;  %v2388_v49 = vadd.f32 %v2387_v42, %v2386_v39  ;;  %v2444_v50 = vadd.f32 %v2443_v44, %v2442_v38 }
 0x168   : > { %v1792_v51 = vsel %vm1772_vm3, %v1766_v40, 0.0  ;;  %1886 = vst.msk [vmem:[%s3232_s17 + $0x28] sm:$0xf] %vm1875_vm1, %v2309_v13  ;;  %v1767_v52 = vmul.f32 %v1734_v46, %v1054_v47  ;;  %v2310_v54 = vpack.c.bf16 %v1054_v47, %v1054_v47  ;;  %v1453_v35 = vadd.f32 %v3283_v31, %v3338_v23 }
 0x169   : > { %v1793_v55 = vadd.f32 %v1792_v51, %v1791_v6  ;;  %v996_v56 = vadd.f32 %v3265_v0, %v899_v48  ;;  %v902_v57 = vadd.f32 %v2388_v49, %v3216_v53  ;;  %v1749_v6 = vpop.permute.xlu0 %1748  ;;  %v1456_v32 = vadd.f32 %v3287_v45, %v3338_v23 }
 0x16a   : > { %v1794_v58 = vsel %vm1772_vm3, %v1767_v52, 0.0  ;;  %1887 = vst.msk [vmem:[%s3232_s17 + $0x2c] sm:$0xf] %vm1875_vm1, %v2310_v54  ;;  %v1464_v5 = vadd.f32 %v3303_v17, %v3338_v23  ;;  %v1469_v31 = vadd.f32 %v3316_v41, %v3338_v23  ;;  %v3361_v42 = vadd.f32 %v2444_v50, %v3338_v23 }
 0x16b   : > { %v1795_v61 = vadd.f32 %v1794_v58, %v1793_v55  ;;  %vm1022_vm14 = vcmp.gt.f32.partialorder %v996_v56, 0.0  ;;  %v1039_v63 = vmul.f32 %v3219_v62, %v996_v56  ;;  %v999_v34 = vadd.f32 %v3270_v10, %v902_v57  ;;  %v2389_v1 = vpop.f32.mrb[28].mxu0  ;;  %v2445_v2 = vpop.f32.mrb[28].mxu1 }
 0x16c   : > { %v2390_v3 = vpop.f32.mrb[29].mxu0  ;;  %v2446_v7 = vpop.f32.mrb[29].mxu1 }
 0x16d   : > { %v1055_v8 = vsel %vm1022_vm14, %v996_v56, %v1039_v63  ;;  %vm1023_vm15 = vcmp.gt.f32.partialorder %v999_v34, 0.0  ;;  %v1040_v0 = vmul.f32 %v3219_v62, %v999_v34  ;;  %v2391_v43 = vadd.f32 %v2390_v3, %v2389_v1  ;;  %v2392_v9 = vpop.f32.mrb[30].mxu0  ;;  %v2448_v11 = vpop.f32.mrb[30].mxu1 }
 0x16e   : > { %v2311_v12 = vpack.c.bf16 %v1055_v8, %v1055_v8  ;;  %v1768_v14 = vmul.f32 %v1739_v59, %v1055_v8  ;;  %v3330_v15 = vadd.f32 %v2446_v7, %v2445_v2  ;;  %v2393_v16 = vpop.f32.mrb[31].mxu0  ;;  %v2449_v18 = vpop.f32.mrb[31].mxu1 }
 0x16f   : > { %v1744_v10 = vpop.permute.xlu1 %1743  ;;  %v1056_v19 = vsel %vm1023_vm15, %v999_v34, %v1040_v0  ;;  %v907_v20 = vadd.f32 %v2391_v43, %v3216_v53  ;;  %v2394_v21 = vadd.f32 %v2393_v16, %v2392_v9  ;;  %v3333_v22 = vadd.f32 %v2449_v18, %v2448_v11 }
 0x170   : > { %1888 = vst.msk [vmem:[%s3232_s17 + $0x30] sm:$0xf] %vm1875_vm1, %v2311_v12  ;;  %v1769_v24 = vmul.f32 %v1744_v10, %v1056_v19  ;;  %v1796_v25 = vsel %vm1772_vm3, %v1768_v14, 0.0  ;;  %v2312_v26 = vpack.c.bf16 %v1056_v19, %v1056_v19  ;;  %v1477_v9 = vadd.f32 %v3330_v15, %v3338_v23 }
 0x171   : > { %v1797_v27 = vadd.f32 %v1796_v25, %v1795_v61  ;;  %v1004_v28 = vadd.f32 %v3262_v60, %v907_v20  ;;  %v910_v29 = vadd.f32 %v2394_v21, %v3216_v53  ;;  %v1480_v12 = vadd.f32 %v3333_v22, %v3338_v23 }
 0x172   : > { %v1798_v30 = vsel %vm1772_vm3, %v1769_v24, 0.0  ;;  %1889 = vst.msk [vmem:[%s3232_s17 + $0x34] sm:$0xf] %vm1875_vm1, %v2312_v26 }
 0x173   : > { %v1799_v36 = vadd.f32 %v1798_v30, %v1797_v27  ;;  %vm1024_vm2 = vcmp.gt.f32.partialorder %v1004_v28, 0.0  ;;  %v1041_v60 = vmul.f32 %v3219_v62, %v1004_v28  ;;  %v1007_v53 = vadd.f32 %v3267_v4, %v910_v29  ;;  %v2451_v37 = vpop.f32.mrb[32].mxu1  ;;  %v2541_v39 = vpop.f32.mrb[32].mxu0 }
 0x174   : > { %v1558_v38 = vadd.f32 %v2541_v39, %v1461_v33  ;;  %v2452_v40 = vpop.f32.mrb[33].mxu1  ;;  %v1549_v13 = vpop.f32.mrb[33].mxu0 }
 0x175   : > { %v1057_v45 = vsel %vm1024_vm2, %v1004_v28, %v1041_v60  ;;  %vm1025_vm4 = vcmp.gt.f32.partialorder %v1007_v53, 0.0  ;;  %v1042_v44 = vmul.f32 %v3219_v62, %v1007_v53  ;;  %v2453_v4 = vadd.f32 %v2452_v40, %v2451_v37  ;;  %v2454_v46 = vpop.f32.mrb[34].mxu1  ;;  %v2542_v47 = vpop.f32.mrb[34].mxu0 }
 0x176   : > { %v1770_v48 = vmul.f32 %v1749_v6, %v1057_v45  ;;  %v2313_v49 = vpack.c.bf16 %v1057_v45, %v1057_v45  ;;  %vm1614_vm5 = vcmp.gt.f32.partialorder %v1558_v38, 0.0  ;;  %v1630_v17 = vmul.f32 %v1558_v38, %v3219_v62  ;;  %v2455_v51 = vpop.f32.mrb[35].mxu1  ;;  %v1552_v52 = vpop.f32.mrb[35].mxu0 }
 0x177   : > { %v1754_v41 = vpop.permute.xlu1 %1753  ;;  %v1058_v50 = vsel %vm1025_vm4, %v1007_v53, %v1042_v44  ;;  %v1550_v54 = vadd.f32 %v1549_v13, %v1453_v35  ;;  %v1561_v55 = vadd.f32 %v2542_v47, %v1464_v5  ;;  %v3365_v56 = vadd.f32 %v2455_v51, %v2454_v46 }
 0x178   : > { %v1800_v57 = vsel %vm1772_vm3, %v1770_v48, 0.0  ;;  %1890 = vst.msk [vmem:[%s3232_s17 + $0x38] sm:$0xf] %vm1875_vm1, %v2313_v49  ;;  %v1771_v58 = vmul.f32 %v1754_v41, %v1058_v50  ;;  %v2314_v59 = vpack.c.bf16 %v1058_v50, %v1058_v50  ;;  %v1646_v61 = vsel %vm1614_vm5, %v1558_v38, %v1630_v17 }
 0x179   : > { %v1801_v63 = vadd.f32 %v1800_v57, %v1799_v36  ;;  %v2317_v34 = vpack.c.bf16 %v1646_v61, %v1646_v61  ;;  %vm1612_vm6 = vcmp.gt.f32.partialorder %v1550_v54, 0.0  ;;  %v1628_v1 = vmul.f32 %v1550_v54, %v3219_v62 }
 0x17a   : > { %v1802_v2 = vsel %vm1772_vm3, %v1771_v58, 0.0  ;;  %1891 = vst.msk [vmem:[%s3232_s17 + $0x3c] sm:$0xf] %vm1875_vm1, %v2314_v59  ;;  %vm1615_vm7 = vcmp.gt.f32.partialorder %v1561_v55, 0.0  ;;  %v1631_v3 = vmul.f32 %v1561_v55, %v3219_v62  ;;  %v1553_v7 = vadd.f32 %v1552_v52, %v1456_v32  ;;  %s2824_s17 = smov [#allocation6]  }
 0x17b   : > { %v1803_v8 = vadd.f32 %v1802_v2, %v1801_v63  ;;  %1959 = vst.msk [vmem:[%s3372_s19 + $0x8] sm:$0xf] %vm1956_vm0, %v2317_v34  ;;  %v1644_v0 = vsel %vm1612_vm6, %v1550_v54, %v1628_v1  ;;  %v2457_v43 = vpop.f32.mrb[36].mxu1  ;;  %v2545_v11 = vpop.f32.mrb[36].mxu0  ;;  %v1485_v6 = vadd.f32 %v2453_v4, %v3338_v23  ;;  %v1488_v51 = vadd.f32 %v3365_v56, %v3338_v23  ;;  %s2756_s23 = sshll.u32 %s2824_s17, 4  ;;  %s2757_s23 = int_to_ptr.vmem [resolvable:$false] %s2756_s23 }
 0x17c   : > { %v2315_v14 = vpack.c.bf16 %v1644_v0, %v1644_v0  ;;  %v1647_v16 = vsel %vm1615_vm7, %v1561_v55, %v1631_v3  ;;  %vm1613_vm1 = vcmp.gt.f32.partialorder %v1553_v7, 0.0  ;;  %v1629_v18 = vmul.f32 %v1553_v7, %v3219_v62  ;;  %v2458_v10 = vpop.f32.mrb[37].mxu1  ;;  %v1565_v19 = vpop.f32.mrb[37].mxu0  ;;  %s2758_s22 = scalar_lea.vmem %s2757_s23, 256  ;;  %p2759_p9 = scmp.lt.s32.totalorder %s3429_s14, %s2757_s23 }
 0x17d   : > { %v1804_v20 = vrot.slane %v1803_v8, 4  ;;  %v2318_v21 = vpack.c.bf16 %v1647_v16, %v1647_v16  ;;  %v1574_v24 = vadd.f32 %v2545_v11, %v1477_v9  ;;  %v2459_v25 = vadd.f32 %v2458_v10, %v2457_v43  ;;  %v2460_v26 = vpop.f32.mrb[38].mxu1  ;;  %v2546_v27 = vpop.f32.mrb[38].mxu0  ;;  %p2760_p13 = scmp.lt.s32.totalorder %s2758_s22, %s2752_s24 }
 0x17e   : > { %1957 = vst.msk [vmem:[%s3372_s19] sm:$0xf] %vm1956_vm0, %v2315_v14  ;;  %v1645_v15 = vsel %vm1613_vm1, %v1553_v7, %v1629_v18  ;;  %v1566_v28 = vadd.f32 %v1565_v19, %v1469_v31  ;;  %v1577_v22 = vadd.f32 %v2546_v27, %v1480_v12  ;;  %v2461_v29 = vpop.f32.mrb[39].mxu1  ;;  %v1568_v30 = vpop.f32.mrb[39].mxu0 }
 0x17f   : > { %v1805_v33 = vadd.f32 %v1804_v20, %v1803_v8  ;;  %1960 = vst.msk [vmem:[%s3372_s19 + $0xc] sm:$0xf] %vm1956_vm0, %v2318_v21  ;;  %v2316_v35 = vpack.c.bf16 %v1645_v15, %v1645_v15  ;;  %vm1618_vm8 = vcmp.gt.f32.partialorder %v1574_v24, 0.0  ;;  %v1634_v32 = vmul.f32 %v1574_v24, %v3219_v62  ;;  %p2761_p1 = por %p2760_p13, %p2759_p9 }
 0x180   : > { %vm1616_vm9 = vcmp.gt.f32.partialorder %v1566_v28, 0.0  ;;  %v1632_v36 = vmul.f32 %v1566_v28, %v3219_v62  ;;  %vm1619_vm10 = vcmp.gt.f32.partialorder %v1577_v22, 0.0  ;;  %v1635_v60 = vmul.f32 %v1577_v22, %v3219_v62 }
 0x181   : > { %v1806_v53 = vrot.slane %v1805_v33, 2  ;;  %1958 = vst.msk [vmem:[%s3372_s19 + $0x4] sm:$0xf] %vm1956_vm0, %v2316_v35  ;;  %v1650_v37 = vsel %vm1618_vm8, %v1574_v24, %v1634_v32  ;;  %v2462_v39 = vadd.f32 %v2461_v29, %v2460_v26  ;;  %v1569_v38 = vadd.f32 %v1568_v30, %v3361_v42  ;;  %p2762_p3 = pnand %p2761_p1, %p2755_p8 }
 0x182   : > { %v2321_v40 = vpack.c.bf16 %v1650_v37, %v1650_v37  ;;  %v1648_v13 = vsel %vm1616_vm9, %v1566_v28, %v1632_v36  ;;  %v1651_v5 = vsel %vm1619_vm10, %v1577_v22, %v1635_v60  ;;  %v1493_v31 = vadd.f32 %v2459_v25, %v3338_v23 }
 0x183   : > { %v2319_v45 = vpack.c.bf16 %v1648_v13, %v1648_v13  ;;  %v2322_v44 = vpack.c.bf16 %v1651_v5, %v1651_v5  ;;  %vm1617_vm11 = vcmp.gt.f32.partialorder %v1569_v38, 0.0  ;;  %v1633_v4 = vmul.f32 %v1569_v38, %v3219_v62  ;;  %v2463_v46 = vpop.f32.mrb[40].mxu1  ;;  %v2549_v47 = vpop.f32.mrb[40].mxu0 }
 0x184   : > { %1963 = vst.msk [vmem:[%s3372_s19 + $0x18] sm:$0xf] %vm1956_vm0, %v2321_v40  ;;  %v1590_v48 = vadd.f32 %v2549_v47, %v1493_v31  ;;  %v2464_v49 = vpop.f32.mrb[41].mxu1  ;;  %v1581_v42 = vpop.f32.mrb[41].mxu0  ;;  %v1496_v17 = vadd.f32 %v2462_v39, %v3338_v23  ;;  %v1807_v57 = vadd.f32 %v1806_v53, %v1805_v33 }
 0x185   : > { %1961 = vst.msk [vmem:[%s3372_s19 + $0x10] sm:$0xf] %vm1956_vm0, %v2319_v45  ;;  %1964 = vst.msk [vmem:[%s3372_s19 + $0x1c] sm:$0xf] %vm1956_vm0, %v2322_v44  ;;  %v1649_v52 = vsel %vm1617_vm11, %v1569_v38, %v1633_v4  ;;  %v2465_v41 = vadd.f32 %v2464_v49, %v2463_v46  ;;  %v1582_v50 = vadd.f32 %v1581_v42, %v1485_v6  ;;  %v2466_v54 = vpop.f32.mrb[42].mxu1  ;;  %v2550_v55 = vpop.f32.mrb[42].mxu0 }
 0x186   : > { %v2320_v58 = vpack.c.bf16 %v1649_v52, %v1649_v52  ;;  %vm1622_vm12 = vcmp.gt.f32.partialorder %v1590_v48, 0.0  ;;  %v1638_v59 = vmul.f32 %v1590_v48, %v3219_v62  ;;  %v1593_v61 = vadd.f32 %v2550_v55, %v1496_v17  ;;  %v2467_v63 = vpop.f32.mrb[43].mxu1  ;;  %v1584_v56 = vpop.f32.mrb[43].mxu0 }
 0x187   : > { %vm1620_vm13 = vcmp.gt.f32.partialorder %v1582_v50, 0.0  ;;  %v1636_v34 = vmul.f32 %v1582_v50, %v3219_v62  ;;  %v2468_v1 = vadd.f32 %v2467_v63, %v2466_v54  ;;  %v1585_v2 = vadd.f32 %v1584_v56, %v1488_v51 }
 0x188   : > { %1962 = vst.msk [vmem:[%s3372_s19 + $0x14] sm:$0xf] %vm1956_vm0, %v2320_v58  ;;  %v1654_v3 = vsel %vm1622_vm12, %v1590_v48, %v1638_v59  ;;  %vm1623_vm14 = vcmp.gt.f32.partialorder %v1593_v61, 0.0  ;;  %v1639_v7 = vmul.f32 %v1593_v61, %v3219_v62  ;;  %v1808_v12 = vrot.slane %v1807_v57, 1 }
 0x189   : > { %v2325_v8 = vpack.c.bf16 %v1654_v3, %v1654_v3  ;;  %v1652_v0 = vsel %vm1620_vm13, %v1582_v50, %v1636_v34  ;;  %vm1621_vm15 = vcmp.gt.f32.partialorder %v1585_v2, 0.0  ;;  %v1637_v43 = vmul.f32 %v1585_v2, %v3219_v62 }
 0x18a   : > { %v2323_v9 = vpack.c.bf16 %v1652_v0, %v1652_v0  ;;  %v1655_v11 = vsel %vm1623_vm14, %v1593_v61, %v1639_v7  ;;  %v1501_v19 = vadd.f32 %v2465_v41, %v3338_v23  ;;  %v1809_v25 = vadd.f32 %v1808_v12, %v1807_v57 }
 0x18b   : > { %1967 = vst.msk [vmem:[%s3372_s19 + $0x28] sm:$0xf] %vm1956_vm0, %v2325_v8  ;;  %v2326_v14 = vpack.c.bf16 %v1655_v11, %v1655_v11  ;;  %v1653_v16 = vsel %vm1621_vm15, %v1585_v2, %v1637_v43  ;;  %v2469_v18 = vpop.f32.mrb[44].mxu1  ;;  %v2553_v10 = vpop.f32.mrb[44].mxu0  ;;  %v1504_v29 = vadd.f32 %v2468_v1, %v3338_v23 }
 0x18c   : > { %1965 = vst.msk [vmem:[%s3372_s19 + $0x20] sm:$0xf] %vm1956_vm0, %v2323_v9  ;;  %v2324_v20 = vpack.c.bf16 %v1653_v16, %v1653_v16  ;;  %v2470_v21 = vpop.f32.mrb[45].mxu1  ;;  %v1597_v24 = vpop.f32.mrb[45].mxu0 }
 0x18d   : > { %1968 = vst.msk [vmem:[%s3372_s19 + $0x2c] sm:$0xf] %vm1956_vm0, %v2326_v14  ;;  %v2471_v26 = vadd.f32 %v2470_v21, %v2469_v18  ;;  %v1598_v27 = vadd.f32 %v1597_v24, %v1501_v19  ;;  %v2472_v15 = vpop.f32.mrb[46].mxu1  ;;  %v2554_v28 = vpop.f32.mrb[46].mxu0 }
 0x18e   : > { %1966 = vst.msk [vmem:[%s3372_s19 + $0x24] sm:$0xf] %vm1956_vm0, %v2324_v20  ;;  %v2473_v22 = vpop.f32.mrb[47].mxu1  ;;  %v1600_v30 = vpop.f32.mrb[47].mxu0 }
 0x18f   : > { %1810 = vst.msk [vmem:[%s428_s13] sm:$0xff] %vm1772_vm3, %v1809_v25  ;;  %v1509_v6 = vadd.f32 %v2471_v26, %v3338_v23  ;;  %vm1624_vm2 = vcmp.gt.f32.partialorder %v1598_v27, 0.0  ;;  %v1640_v33 = vmul.f32 %v1598_v27, %v3219_v62  ;;  %v2474_v35 = vadd.f32 %v2473_v22, %v2472_v15 }
 0x190   : > { %2765 = shalt.err (!%p2762_p3)
}
 0x191   : > { %s2766_s28 = scalar_lea.hbm %s3427_s27, 128  ;;  %s2770_s29 = scalar_lea.hbm %s3501_s10, 384 }
 0x192   : > { %p2767_p4 = scmp.ne.s32.totalorder %s3427_s27, %s2766_s28  ;;  %p2771_p2 = scmp.lt.u32.totalorder %s3427_s27, %s3501_s10 }
 0x193   : > { %p2772_p7 = scmp.lt.u32.totalorder %s2770_s29, %s2766_s28  ;;  %p2774_p10 = scmp.lt.u32.totalorder %s2766_s28, %s3427_s27 }
 0x194   : > { %p2768_p5 = pnand %p2767_p4, %p3512_p11 }
 0x195   : > { %p2773_p6 = por %p2772_p7, %p2771_p2 }
 0x196   : > { %p2769_p0 = pneg %p2768_p5 }
 0x197   : > { %p2775_p12 = por %p2774_p10, %p2773_p6 }
 0x199   : > { %p2776_p8 = pnand %p2775_p12, %p2769_p0 }
 0x19b   : > { %2779 = shalt.err (!%p2776_p8)
}
 0x19c   : > { %2561 = dma.vmem_to_hbm [thread:$0]  (%p3512_p11), %s3429_s14, 128, %s3427_s27, %s1984_s12   ;;  %v1601_v32 = vadd.f32 %v1600_v30, %v1504_v29  ;;  %v1606_v36 = vadd.f32 %v2553_v10, %v1509_v6  ;;  %v1656_v60 = vsel %vm1624_vm2, %v1598_v27, %v1640_v33  ;;  %v1512_v53 = vadd.f32 %v2474_v35, %v3338_v23 }
 0x19d   : > { %v2327_v37 = vpack.c.bf16 %v1656_v60, %v1656_v60 }
 0x19e   : > { %vm1625_vm3 = vcmp.gt.f32.partialorder %v1601_v32, 0.0  ;;  %v1641_v39 = vmul.f32 %v1601_v32, %v3219_v62  ;;  %vm1626_vm4 = vcmp.gt.f32.partialorder %v1606_v36, 0.0  ;;  %v1642_v38 = vmul.f32 %v1606_v36, %v3219_v62 }
 0x19f   : > { %v1609_v40 = vadd.f32 %v2554_v28, %v1512_v53  ;;  %1969 = vst.msk [vmem:[%s3372_s19 + $0x30] sm:$0xf] %vm1956_vm0, %v2327_v37 }
 0x1a0   : > { %v1657_v13 = vsel %vm1625_vm3, %v1601_v32, %v1641_v39  ;;  %v1658_v5 = vsel %vm1626_vm4, %v1606_v36, %v1642_v38 }
 0x1a1   : > { %vm1627_vm5 = vcmp.gt.f32.partialorder %v1609_v40, 0.0  ;;  %v1643_v31 = vmul.f32 %v1609_v40, %v3219_v62  ;;  %v2328_v45 = vpack.c.bf16 %v1657_v13, %v1657_v13  ;;  %v2329_v44 = vpack.c.bf16 %v1658_v5, %v1658_v5 }
 0x1a3   : > { %v1659_v23 = vsel %vm1627_vm5, %v1609_v40, %v1643_v31  ;;  %1970 = vst.msk [vmem:[%s3372_s19 + $0x34] sm:$0xf] %vm1956_vm0, %v2328_v45  ;;  %1971 = vst.msk [vmem:[%s3372_s19 + $0x38] sm:$0xf] %vm1956_vm0, %v2329_v44 }
 0x1a4   : > { %v2330_v4 = vpack.c.bf16 %v1659_v23, %v1659_v23 }
 0x1a6   : > { %1972 = vst.msk [vmem:[%s3372_s19 + $0x3c] sm:$0xf] %vm1956_vm0, %v2330_v4 }
 0x1a7 PF: > { %p2572_p11 = scmp.ge.s32.totalorder %s2818_s18, 2  ;;  %s2033_s25 = sand.u32 1, %s2806_s15  }
 0x1a8   : > { %p3513_p9 = scmp.ne.s32.totalorder %s3509_s26, 0  ;;  %s2034_s14 = scalar_lea.sflag [#allocation5], %s2033_s25 }
 0x1aa   : > { %p2568_p13 = pnand %p2572_p11, %p3513_p9 }
 0x1ac   : > { %2801 = dma.done.wait (!%p2568_p13), %s2034_s14, 128  }
 0x1ad   : > { %2803 = vsyncadd (!%p2568_p13), %s2034_s14, 4294967168  ;;  %s3514_s7 = sld [smem:[#allocation9_spill]]  ;;  %s3515_s17 = sld [smem:[#allocation10_spill]] }
 0x1ae   : > { %p25_p1 = scmp.ge.s32.totalorder %s2908_s20, 5   ;;  %s3516_s15 = smov %s2810_s16 }
 0x1af   : > { %s3518_s18 = smov %s2908_s20 }
 0x1b0   :  { %27 = sbr.rel (!%p25_p1) target bundleno = 8 (0x8), region = 127 }
 0x1b3   : > { %s3517_s16 = smov %s3514_s7 }
 0x1b7   :  { %2039 = vsyncpa [#allocation4], 1 }
 0x1b8   :  { %2041 = vsyncpa [#allocation4 + $0x1], 1 }
 0x1b9   :  { %2042 = vsyncpa [#allocation5], 1 }
 0x1ba   :  { %2044 = vsyncpa [#allocation5 + $0x1], 1 }

// kernel: tpu_custom_call.1
= control target key start
LH: loop header
LB: loop body
LE: loop exit
PB: predicated region body
PF: predicated region fallthrough
CT: control target
= control target key end

     0   :  { %s3491_s0 = inlined_call_operand.vmem [shape: bf16[384,64], index: 0, kind: input, shape index: {}]   ;;  %s3492_s1 = inlined_call_operand.vmem [shape: bf16[384,32], index: 1, kind: input, shape index: {}]   ;;  %s3493_s2 = inlined_call_operand.vmem [shape: bf16[384,384], index: 2, kind: input, shape index: {}]   ;;  %s3494_s3 = inlined_call_operand.hbm [shape: bf16[384,384], index: 3, kind: input, shape index: {}]   ;;  %s3495_s4 = inlined_call_operand.vmem [shape: f32[384,1], index: 4, kind: input, shape index: {}]   ;;  %s3496_s5 = inlined_call_operand.vmem [shape: f32[1,64], index: 5, kind: input, shape index: {}]   ;;  %s3497_s6 = inlined_call_operand.vmem [shape: f32[1,32], index: 6, kind: input, shape index: {}]   ;;  %s3498_s7 = inlined_call_operand.<no memory space> [shape: f32[1,1], index: 7, kind: input, shape index: {}]   ;;  %s3499_s8 = inlined_call_operand.vmem [shape: bf16[384,64], index: 8, kind: output, shape index: {0}]   ;;  %s3500_s9 = inlined_call_operand.vmem [shape: bf16[384,32], index: 9, kind: output, shape index: {1}]   ;;  %s3501_s10 = inlined_call_operand.hbm [shape: f32[24,64], index: 10, kind: output, shape index: {2}]  }
   0x1   :  { %3504 = sst [smem:[#allocation11_spill]] %s3494_s3 }
   0x2   :  { %16 = sst [smem:[#allocation2]] %s3498_s7 }
   0x3   :  { %17 = vsyncpa [#allocation4], 0 }
   0x4   :  { %19 = vsyncpa [#allocation4 + $0x1], 0 }
   0x5   :  { %20 = vsyncpa [#allocation5], 0 }
   0x6   :  { %22 = vsyncpa [#allocation5 + $0x1], 0  ;;  %s2883_s15 = smov 0   ;;  %s2885_s16 = smov 0  }
   0x7   :  { %s2887_s17 = smov 0   ;;  %s2889_s18 = smov 0  }
   0x8 LB: > { %3505 = sst [smem:[#allocation9_spill]] %s2814_s17  ;;  %s2904_s7 = sadd.s32 4294967295, %s2818_s18   ;;  %s2818_s18 = sphi %s2889_s18, %s3518_s18   ;;  %s2814_s17 = sphi %s2887_s17, %s3515_s17   ;;  %s2810_s16 = sphi %s2885_s16, %s3517_s16   ;;  %s2806_s15 = sphi %s2883_s15, %s3516_s15  }
   0x9   : > { %s2149_s19 = sadd.s32 4294967294, %s2818_s18   ;;  %s2908_s20 = sadd.s32 1, %s2818_s18  }
   0xa   : > { %s103_s21 = sadd.s32 1, %s2814_s17  ;;  %s100_s22 = ssub.s32 %s2818_s18, %s2908_s20 }
   0xb   : > { %p110_p0 = scmp.ne.s32.totalorder %s2814_s17, %s2810_s16  ;;  %p101_p1 = scmp.eq.s32.totalorder %s100_s22, 0 }
   0xc   : > { %p111_p2 = scmp.eq.s32.totalorder %s2818_s18, 0  ;;  %p116_p3 = scmp.ne.s32.totalorder %s2810_s16, %s2806_s15 }
   0xd   : > { %p117_p4 = scmp.eq.s32.totalorder %s2904_s7, 0  ;;  %p281_p7 = scmp.eq.s32.totalorder %s2904_s7, 2 }
   0xe   : > { %s2920_s23 = scalar_select %p101_p1, %s2814_s17, %s103_s21  }
   0xf   : > { %p112_p5 = por %p111_p2, %p110_p0  ;;  %p2922_p6 = por %p117_p4, %p116_p3 }
  0x10   : > { %3506 = sst [smem:[#allocation10_spill]] %s2920_s23  ;;  %p287_p8 = scmp.eq.s32.totalorder %s2149_s19, 2 }
  0x11   : > { %p2571_p9 = scmp.lt.s32.totalorder %s2818_s18, 3  ;;  %p2928_p10 = por %p281_p7, %p110_p0 }
  0x12   : > { %p2932_p11 = por %p287_p8, %p116_p3  ;;  %s332_s27 = sand.u32 1, %s2814_s17  }
  0x13   : > { %s3508_s25 = scalar_select %p2928_p10, 1, 0 }
  0x14   : > { %s3509_s26 = scalar_select %p2932_p11, 1, 0 }
  0x15   : > { %s2556_s28 = smul.u32 3072, %s2818_s18  ;;  %s3510_s3 = sld [smem:[#allocation11_spill]] }
  0x16   : > { %s2555_s29 = smul.u32 192, %s332_s27  ;;  %p2943_p12 = pnand %p2571_p9, %p112_p5 }
  0x17   : > { %s2949_s21 = scalar_lea.sflag [#allocation4], %s332_s27 }
  0x18   : > { %s336_s14 = scalar_lea.vmem [#allocation3], %s2555_s29  ;;  %p2724_p0 = pneg %p2943_p12 }
  0x19   : > { %s344_s19 = sshll.u32 %s336_s14, 4  ;;  %s2947_s19 = int_to_ptr.vmem [resolvable:$true] %s344_s19 }
  0x1b   : > { %s2941_s12 = scalar_lea.hbm %s3510_s3, %s2556_s28  ;;  %s2727_s11 = scalar_lea.hbm %s3510_s3, 9216 }
  0x1c   : > { %s2722_s22 = scalar_lea.hbm %s2941_s12, 3072  ;;  %p2728_p3 = scmp.lt.u32.totalorder %s2941_s12, %s3510_s3 }
  0x1d   : > { %p2723_p13 = scmp.ne.s32.totalorder %s2941_s12, %s2722_s22  ;;  %p2729_p4 = scmp.lt.u32.totalorder %s2727_s11, %s2722_s22 }
  0x1e   : > { %p2731_p7 = scmp.lt.u32.totalorder %s2722_s22, %s2941_s12 }
  0x1f   : > { %p2725_p1 = pnand %p2724_p0, %p2723_p13  ;;  %p2730_p5 = por %p2729_p4, %p2728_p3 }
  0x21   : > { %p2726_p2 = pneg %p2725_p1  ;;  %p2732_p8 = por %p2731_p7, %p2730_p5 }
  0x23   : > { %p2733_p9 = pnand %p2732_p8, %p2726_p2 }
  0x25   : > { %2736 = shalt.err (!%p2733_p9)
}
  0x26   : > { %s2737_s27 = scalar_lea.vmem %s2947_s19, 3072  ;;  %s2820_s29 = smov [#allocation3]  }
  0x27   : > { %p2738_p13 = scmp.ne.s32.totalorder %s2947_s19, %s2737_s27  ;;  %s2742_s14 = sshll.u32 %s2820_s29, 4  ;;  %s2743_s14 = int_to_ptr.vmem [resolvable:$false] %s2742_s14 }
  0x28   : > { %s2744_s17 = scalar_lea.vmem %s2743_s14, 6144  ;;  %p2745_p10 = scmp.lt.s32.totalorder %s2947_s19, %s2743_s14 }
  0x29   : > { %p2740_p1 = pnand %p2738_p13, %p2724_p0  ;;  %p2746_p3 = scmp.lt.s32.totalorder %s2744_s17, %s2737_s27 }
  0x2b   : > { %p2741_p11 = pneg %p2740_p1  ;;  %p2747_p4 = por %p2746_p3, %p2745_p10 }
  0x2d   : > { %p2748_p5 = pnand %p2747_p4, %p2741_p11 }
  0x2f   : > { %2751 = shalt.err (!%p2748_p5)
}
  0x30   : > { %s2821_s23 = smov 192   ;;  %s2822_s22 = smov 12  }
  0x31   : > { %2566 = dma.hbm_to_vmem [thread:$0]  (!%p2943_p12), %s2941_s12, 3072, %s2947_s19, %s2949_s21, %s2821_s23, %s2821_s23, %s2822_s22  }
  0x32   : > { %p2155_p0 = scmp.ge.s32.totalorder %s2818_s18, 1  ;;  %p361_p2 = scmp.lt.s32.totalorder %s2818_s18, 4 }
  0x34   : > { %p362_p7 = pnand %p2155_p0, %p361_p2 }
  0x35   : > { %s2980_s28 = sand.u32 (!%p362_p7), 1, %s2810_s16  }
  0x36   : > { %365 = sbr.rel (%p362_p7) target bundleno = 423 (0x1a7), region = 52  ;;  %s368_s11 = scalar_lea.sflag (!%p362_p7), [#allocation4], %s2980_s28 }
  0x37   : > { %s2557_s30 = smul.u32 (!%p362_p7), 192, %s2980_s28 }
  0x39   : > { %s2984_s27 = scalar_lea.vmem (!%p362_p7), [#allocation3], %s2557_s30 }
  0x3d   : > { %2797 = dma.done.wait (%p2922_p6), %s368_s11, 3072  }
  0x3e   : > { %2799 = vsyncadd (%p2922_p6), %s368_s11, 4294964224  ;;  %v2823_v0 = vmov 0   ;;  %v2610_v1 = vld [vmem:[%s3491_s0 + $0x40] sm:$0xff]   ;;  %v2613_v4 = vld [vmem:[%s3491_s0 + $0x48] sm:$0xff]   ;;  %s2157_s29 = sshll.u32 %s2904_s7, 4  ;;  %vm1875_vm1 = vcmask 519168  }
  0x3f   : > { %2608 = vset.pattern.permute.xlu0 %v2823_v0  ;;  %2609 = vset.pattern.permute.xlu1 %v2823_v0  ;;  %v2611_v2 = vld [vmem:[%s3491_s0 + $0x80] sm:$0xff]   ;;  %v2614_v5 = vld [vmem:[%s3491_s0 + $0x88] sm:$0xff]   ;;  %v2616_v7 = vld [vmem:[%s3491_s0 + $0x50] sm:$0xff]   ;;  %p430_p6 = scmp.lt.s32.totalorder %s2157_s29, 47  ;;  %vm1772_vm3 = vcmask 523264   ;;  %p3512_p11 = scmp.ne.s32.totalorder %s3508_s25, 0 }
  0x40   : > { %2331 = vmatprep.subr.bf16.mxu0 %v2610_v1  ;;  %v2612_v3 = vld [vmem:[%s3491_s0] sm:$0xff]   ;;  %2491 = vmatprep.subr.bf16.mxu1 %v2611_v2  ;;  %v2615_v6 = vld [vmem:[%s3491_s0 + $0x8] sm:$0xff]   ;;  %v2617_v8 = vld [vmem:[%s3491_s0 + $0x90] sm:$0xff]  }
  0x41   : > { %2332 = vmatpush3.bf16.msra.mxu0 %v2612_v3  ;;  %2492 = vmatpush3.bf16.msra.mxu1 %v2611_v2  ;;  %v2618_v9 = vld [vmem:[%s3491_s0 + $0x10] sm:$0xff]   ;;  %v2619_v10 = vld [vmem:[%s3491_s0 + $0x58] sm:$0xff]   ;;  %v2622_v13 = vld [vmem:[%s3491_s0 + $0x60] sm:$0xff]   ;;  %s3520_s29 = smov (!%p430_p6, %s2157_s29), 47 }
  0x42   : > { %2333 = vmatprep.subr.bf16.mxu0 %v2613_v4  ;;  %2493 = vmatprep.subr.bf16.mxu1 %v2614_v5  ;;  %v2620_v11 = vld [vmem:[%s3491_s0 + $0x98] sm:$0xff]   ;;  %v2623_v14 = vld [vmem:[%s3491_s0 + $0xa0] sm:$0xff]   ;;  %v2625_v16 = vld [vmem:[%s3491_s0 + $0x68] sm:$0xff]   ;;  %s2558_s12 = smul.u32 12, %s3520_s29  ;;  %s2160_s30 = sshll.u32 %s3520_s29, 3 }
  0x43   : > { %v2621_v12 = vld [vmem:[%s3491_s0 + $0x18] sm:$0xff]   ;;  %v2624_v15 = vld [vmem:[%s3491_s0 + $0x20] sm:$0xff]   ;;  %v2626_v17 = vld [vmem:[%s3491_s0 + $0xa8] sm:$0xff]   ;;  %s3177_s21 = scalar_lea.vmem %s3495_s4, %s2160_s30 }
  0x44   : > { %v2627_v18 = vld [vmem:[%s3491_s0 + $0x28] sm:$0xff]   ;;  %v2628_v19 = vld [vmem:[%s3491_s0 + $0x70] sm:$0xff]   ;;  %s3060_s13 = scalar_lea.vmem %s3493_s2, %s2558_s12  ;;  %v2631_v22 = vld [vmem:[%s3491_s0 + $0x78] sm:$0xff]   ;;  %s1984_s12 = scalar_lea.sflag [#allocation5], %s2980_s28 }
  0x45   : > { %2334 = vmatpush3.bf16.msra.mxu0 %v2615_v6  ;;  %2494 = vmatpush3.bf16.msra.mxu1 %v2614_v5  ;;  %v2629_v20 = vld [vmem:[%s3491_s0 + $0xb0] sm:$0xff]   ;;  %v2632_v23 = vld [vmem:[%s3491_s0 + $0xb8] sm:$0xff]   ;;  %v2634_v27 = vld [vmem:[%s3060_s13] ss:$12 sps:$4 sm:$0xff]  }
  0x46   : > { %2335 = vmatprep.subr.bf16.mxu0 %v2616_v7  ;;  %2495 = vmatprep.subr.bf16.mxu1 %v2617_v8  ;;  %v2630_v21 = vld [vmem:[%s3491_s0 + $0x30] sm:$0xff]   ;;  %v2633_v26 = vld [vmem:[%s3491_s0 + $0x38] sm:$0xff]   ;;  %v2638_v28 = vld [vmem:[%s3060_s13 + $0x20] ss:$12 sps:$4 sm:$0xff]  }
  0x47   : > { %v2636_v24 = vld [vmem:[%s3060_s13 + $0x4] ss:$12 sps:$4 sm:$0xff]   ;;  %v2637_v25 = vld [vmem:[%s3060_s13 + $0x8] ss:$12 sps:$4 sm:$0xff]   ;;  %v2651_v41 = vld [vmem:[%s3492_s1 + $0x58] sm:$0xff]  }
  0x48   : > { %848 = vmatprep.mubr.bf16.mxu0 %v2636_v24  ;;  %v2639_v29 = vld [vmem:[%s3492_s1 + $0x40] sm:$0xff]   ;;  %2507 = vmatprep.mubr.bf16.mxu1 %v2637_v25  ;;  %v2641_v32 = vld [vmem:[%s3492_s1 + $0x48] sm:$0xff]   ;;  %v2648_v37 = vld [vmem:[%s3060_s13 + $0x50] ss:$12 sps:$4 sm:$0xff]  }
  0x49   : > { %2336 = vmatpush3.bf16.msra.mxu0 %v2618_v9  ;;  %2496 = vmatpush3.bf16.msra.mxu1 %v2617_v8  ;;  %v2640_v30 = vld [vmem:[%s3492_s1] sm:$0xff]   ;;  %v2644_v33 = vld [vmem:[%s3060_s13 + $0x1c] ss:$12 sps:$4 sm:$0xff]   ;;  %v2649_v38 = vld [vmem:[%s3492_s1 + $0x50] sm:$0xff]  }
  0x4a   : > { %2337 = vmatprep.subr.bf16.mxu0 %v2619_v10  ;;  %2497 = vmatprep.subr.bf16.mxu1 %v2620_v11  ;;  %v2642_v31 = vld [vmem:[%s3492_s1 + $0x80] sm:$0xff]   ;;  %v2643_v35 = vld [vmem:[%s3492_s1 + $0x8] sm:$0xff]   ;;  %v2650_v39 = vld [vmem:[%s3492_s1 + $0x10] sm:$0xff]  }
  0x4b   : > { %v2646_v34 = vld [vmem:[%s3060_s13 + $0x38] ss:$12 sps:$4 sm:$0xff]   ;;  %v2652_v40 = vld [vmem:[%s3492_s1 + $0x88] sm:$0xff]   ;;  %v2654_v42 = vld [vmem:[%s3060_s13 + $0x34] ss:$12 sps:$4 sm:$0xff]  }
  0x4c   : > { %v2647_v36 = vld [vmem:[%s3060_s13 + $0x18] ss:$12 sps:$4 sm:$0xff]   ;;  %v2656_v43 = vld [vmem:[%s3060_s13 + $0x68] ss:$12 sps:$4 sm:$0xff]   ;;  %v2657_v45 = vld [vmem:[%s3060_s13 + $0x30] ss:$12 sps:$4 sm:$0xff]  }
  0x4d   : > { %2338 = vmatpush3.bf16.msra.mxu0 %v2621_v12  ;;  %2498 = vmatpush3.bf16.msra.mxu1 %v2620_v11  ;;  %v2653_v44 = vld [vmem:[%s3492_s1 + $0x18] sm:$0xff]   ;;  %v2658_v46 = vld [vmem:[%s3060_s13 + $0x80] ss:$12 sps:$4 sm:$0xff]   ;;  %v2662_v49 = vld [vmem:[%s3492_s1 + $0x90] sm:$0xff]  }
  0x4e   : > { %2339 = vmatprep.subr.bf16.mxu0 %v2622_v13  ;;  %2499 = vmatprep.subr.bf16.mxu1 %v2623_v14  ;;  %v2659_v47 = vld [vmem:[%s3492_s1 + $0x60] sm:$0xff]   ;;  %v2661_v50 = vld [vmem:[%s3492_s1 + $0x68] sm:$0xff]   ;;  %v2669_v55 = vld [vmem:[%s3492_s1 + $0x70] sm:$0xff]  }
  0x4f   : > { %v2660_v48 = vld [vmem:[%s3492_s1 + $0x20] sm:$0xff]   ;;  %v2664_v51 = vld [vmem:[%s3060_s13 + $0x4c] ss:$12 sps:$4 sm:$0xff]   ;;  %v2667_v54 = vld [vmem:[%s3060_s13 + $0x48] ss:$12 sps:$4 sm:$0xff]  }
  0x50   : > { %v2666_v52 = vld [vmem:[%s3060_s13 + $0x98] ss:$12 sps:$4 sm:$0xff]   ;;  %v2663_v53 = vld [vmem:[%s3492_s1 + $0x28] sm:$0xff]   ;;  %v2668_v56 = vld [vmem:[%s3060_s13 + $0xb0] ss:$12 sps:$4 sm:$0xff]  }
  0x51   : > { %2340 = vmatpush3.bf16.msra.mxu0 %v2624_v15  ;;  %2500 = vmatpush3.bf16.msra.mxu1 %v2623_v14  ;;  %v2670_v57 = vld [vmem:[%s3492_s1 + $0x30] sm:$0xff]   ;;  %v2672_v58 = vld [vmem:[%s3492_s1 + $0x98] sm:$0xff]   ;;  %v2680_v63 = vld [vmem:[%s3492_s1 + $0xa0] sm:$0xff]  }
  0x52   : > { %2341 = vmatprep.subr.bf16.mxu0 %v2625_v16  ;;  %2501 = vmatprep.subr.bf16.mxu1 %v2626_v17  ;;  %v2671_v59 = vld [vmem:[%s3492_s1 + $0x78] sm:$0xff]   ;;  %v2674_v60 = vld [vmem:[%s3060_s13 + $0x64] ss:$12 sps:$4 sm:$0xff]   ;;  %v2676_v0 = vld [vmem:[%s2984_s27] ss:$12 sps:$4 sm:$0xff]  }
  0x53   : > { %v2673_v61 = vld [vmem:[%s3492_s1 + $0x38] sm:$0xff]   ;;  %v2678_v62 = vld [vmem:[%s2984_s27 + $0x4] ss:$12 sps:$4 sm:$0xff]   ;;  %v2679_v1 = vld [vmem:[%s3060_s13 + $0x60] ss:$12 sps:$4 sm:$0xff]  }
  0x54   : > { %v2681_v2 = vld [vmem:[%s3060_s13 + $0x7c] ss:$12 sps:$4 sm:$0xff]   ;;  %v2694_v5 = vld [vmem:[%s3492_s1 + $0xb0] sm:$0xff]   ;;  %v2685_v6 = vld [vmem:[%s3060_s13 + $0x78] ss:$12 sps:$4 sm:$0xff]  }
  0x55   : > { %2342 = vmatpush3.bf16.msra.mxu0 %v2627_v18  ;;  %2502 = vmatpush3.bf16.msra.mxu1 %v2626_v17  ;;  %v2683_v3 = vld [vmem:[%s2984_s27 + $0x1c] ss:$12 sps:$4 sm:$0xff]   ;;  %v2686_v7 = vld [vmem:[%s2984_s27 + $0x18] ss:$12 sps:$4 sm:$0xff]   ;;  %v2688_v8 = vld [vmem:[%s3060_s13 + $0x94] ss:$12 sps:$4 sm:$0xff]  }
  0x56   : > { %2343 = vmatprep.subr.bf16.mxu0 %v2628_v19  ;;  %2503 = vmatprep.subr.bf16.mxu1 %v2629_v20  ;;  %v2687_v4 = vld [vmem:[%s3492_s1 + $0xa8] sm:$0xff]   ;;  %v2701_v9 = vld [vmem:[%s3492_s1 + $0xb8] sm:$0xff]   ;;  %v2690_v10 = vld [vmem:[%s2984_s27 + $0x34] ss:$12 sps:$4 sm:$0xff]  }
  0x57   : > { %v2692_v11 = vld [vmem:[%s3060_s13 + $0x90] ss:$12 sps:$4 sm:$0xff]   ;;  %v2695_v13 = vld [vmem:[%s3060_s13 + $0xac] ss:$12 sps:$4 sm:$0xff]   ;;  %v1660_v15 = vld [vmem:[%s3177_s21] sm:$0xff] }
  0x58   : > { %v2693_v12 = vld [vmem:[%s2984_s27 + $0x30] ss:$12 sps:$4 sm:$0xff]   ;;  %v2697_v14 = vld [vmem:[%s2984_s27 + $0x4c] ss:$12 sps:$4 sm:$0xff]   ;;  %1678 = vperm.xlu0 %2608, %v1660_v15   ;;  %v2699_v17 = vld [vmem:[%s3060_s13 + $0xa8] ss:$12 sps:$4 sm:$0xff]  }
  0x59   : > { %2344 = vmatpush3.bf16.msra.mxu0 %v2630_v21  ;;  %2504 = vmatpush3.bf16.msra.mxu1 %v2629_v20  ;;  %v1662_v16 = vld [vmem:[%s3177_s21 + $0x10] sm:$0xff]  ;;  %v1661_v19 = vld [vmem:[%s3177_s21 + $0x8] sm:$0xff]  ;;  %s456_s13 = sld [smem:[#allocation2]] }
  0x5a   : > { %2345 = vmatprep.subr.bf16.mxu0 %v2631_v22  ;;  %2505 = vmatprep.subr.bf16.mxu1 %v2632_v23  ;;  %v2700_v18 = vld [vmem:[%s2984_s27 + $0x48] ss:$12 sps:$4 sm:$0xff]   ;;  %v2702_v20 = vld [vmem:[%s2984_s27 + $0x64] ss:$12 sps:$4 sm:$0xff]   ;;  %v1663_v22 = vld [vmem:[%s3177_s21 + $0x18] sm:$0xff] }
  0x5b   : > { %1688 = vperm.xlu1 %2609, %v1662_v16   ;;  %v2704_v21 = vld [vmem:[%s2984_s27 + $0x8] ss:$12 sps:$4 sm:$0xff]   ;;  %v2705_v25 = vld [vmem:[%s2984_s27 + $0x60] ss:$12 sps:$4 sm:$0xff]  }
  0x5c   : > { %1683 = vperm.xlu0 %2608, %v1661_v19   ;;  %v1665_v24 = vld [vmem:[%s3177_s21 + $0x28] sm:$0xff] }
  0x5d   : > { %2346 = vmatpush3.bf16.msra.mxu0 %v2633_v26  ;;  %2506 = vmatpush3.bf16.msra.mxu1 %v2632_v23  ;;  %v1664_v23 = vld [vmem:[%s3177_s21 + $0x20] sm:$0xff] }
  0x5e   : > { %2411 = vmatprep.subr.bf16.mxu1 %v2639_v29  ;;  %2523 = vmatprep.subr.bf16.mxu0 %v2642_v31  ;;  %v2706_v26 = vld [vmem:[%s2984_s27 + $0x20] ss:$12 sps:$4 sm:$0xff]   ;;  %v2709_v29 = vld [vmem:[%s2984_s27 + $0x38] ss:$12 sps:$4 sm:$0xff]  }
  0x5f   : > { %1693 = vperm.xlu1 %2609, %v1663_v22  }
  0x60   : > { %849 = vmatmul.mubr.bf16.vlgmr.msra.gmra.mrb[0].mxu0 %v2634_v27  ;;  %2508 = vmatmul.mubr.bf16.vlgmr.msra.gmra.mrb[0].mxu1 %v2638_v28  ;;  %v1666_v27 = vld [vmem:[%s3177_s21 + $0x30] sm:$0xff]  ;;  %v2707_v28 = vld [vmem:[%s2984_s27 + $0x7c] ss:$12 sps:$4 sm:$0xff]  }
  0x61   : > { %2412 = vmatpush3.bf16.msra.mxu1 %v2640_v30  ;;  %2524 = vmatpush3.bf16.msra.mxu0 %v2642_v31  ;;  %v1667_v30 = vld [vmem:[%s3177_s21 + $0x38] sm:$0xff]  ;;  %v1668_v31 = vld [vmem:[%s3177_s21 + $0x40] sm:$0xff] }
  0x62   : > { %2413 = vmatprep.subr.bf16.mxu1 %v2641_v32  ;;  %856 = vmatprep.mubr.bf16.mxu0 %v2644_v33  ;;  %v1669_v32 = vld [vmem:[%s3177_s21 + $0x48] sm:$0xff]  ;;  %v2710_v33 = vld [vmem:[%s2984_s27 + $0x78] ss:$12 sps:$4 sm:$0xff]  }
  0x63   : > { %2511 = vmatprep.mubr.bf16.mxu1 %v2646_v34  ;;  %2525 = vmatprep.subr.bf16.mxu0 %v2652_v40  ;;  %v2711_v34 = vld [vmem:[%s2984_s27 + $0x50] ss:$12 sps:$4 sm:$0xff]  }
  0x64   : > { %1698 = vperm.xlu0 %2608, %v1664_v23   ;;  %1703 = vperm.xlu1 %2609, %v1665_v24  }
  0x65   : > { %2414 = vmatpush3.bf16.msra.mxu1 %v2643_v35  ;;  %2526 = vmatpush3.bf16.msra.mxu0 %v2652_v40  ;;  %v1670_v35 = vld [vmem:[%s3177_s21 + $0x50] sm:$0xff]  ;;  %v1673_v40 = vld [vmem:[%s3177_s21 + $0x68] sm:$0xff] }
  0x66   : > { %2415 = vmatprep.subr.bf16.mxu1 %v2649_v38  ;;  %2527 = vmatprep.subr.bf16.mxu0 %v2662_v49  ;;  %v1671_v38 = vld [vmem:[%s3177_s21 + $0x58] sm:$0xff] }
  0x68   : > { %857 = vmatmul.mubr.bf16.gmra.mrb[4].mxu0 %v2647_v36  ;;  %2512 = vmatmul.mubr.bf16.gmra.mrb[4].mxu1 %v2648_v37  ;;  %v2712_v36 = vld [vmem:[%s2984_s27 + $0x94] ss:$12 sps:$4 sm:$0xff]  }
  0x69   : > { %2416 = vmatpush3.bf16.msra.mxu1 %v2650_v39  ;;  %864 = vmatprep.mubr.bf16.mxu0 %v2654_v42  ;;  %v2714_v37 = vld [vmem:[%s2984_s27 + $0x68] ss:$12 sps:$4 sm:$0xff]   ;;  %v1672_v39 = vld [vmem:[%s3177_s21 + $0x60] sm:$0xff] }
  0x6a   : > { %2417 = vmatprep.subr.bf16.mxu1 %v2651_v41  ;;  %2515 = vmatprep.mubr.bf16.mxu1 %v2656_v43  ;;  %v2715_v41 = vld [vmem:[%s2984_s27 + $0x90] ss:$12 sps:$4 sm:$0xff]   ;;  %v2716_v42 = vld [vmem:[%s2984_s27 + $0x80] ss:$12 sps:$4 sm:$0xff]  }
  0x6b   : > { %2528 = vmatpush3.bf16.msra.mxu0 %v2662_v49  ;;  %1708 = vperm.xlu0 %2608, %v1666_v27   ;;  %v1674_v43 = vld [vmem:[%s3177_s21 + $0x70] sm:$0xff] }
  0x6c   : > { %2529 = vmatprep.subr.bf16.mxu0 %v2672_v58  ;;  %1713 = vperm.xlu1 %2609, %v1667_v30  }
  0x6d   : > { %2418 = vmatpush3.bf16.msra.mxu1 %v2653_v44  ;;  %v2717_v44 = vld [vmem:[%s2984_s27 + $0xac] ss:$12 sps:$4 sm:$0xff]  }
  0x6e   : > { %2419 = vmatprep.subr.bf16.mxu1 %v2659_v47  ;;  %v2720_v47 = vld [vmem:[%s2984_s27 + $0xa8] ss:$12 sps:$4 sm:$0xff]  }
  0x6f   : > { %2530 = vmatpush3.bf16.msra.mxu0 %v2672_v58  ;;  %1718 = vperm.xlu0 %2608, %v1668_v31  }
  0x70   : > { %865 = vmatmul.mubr.bf16.gmra.mrb[8].mxu0 %v2657_v45  ;;  %2516 = vmatmul.mubr.bf16.gmra.mrb[8].mxu1 %v2658_v46  ;;  %v2719_v45 = vld [vmem:[%s2984_s27 + $0x98] ss:$12 sps:$4 sm:$0xff]  }
  0x71   : > { %2420 = vmatpush3.bf16.msra.mxu1 %v2660_v48  ;;  %872 = vmatprep.mubr.bf16.mxu0 %v2664_v51  ;;  %v1675_v46 = vld [vmem:[%s3177_s21 + $0x78] sm:$0xff]  ;;  %s2296_s21 = sshll.u32 %s2904_s7, 7 }
  0x72   : > { %2421 = vmatprep.subr.bf16.mxu1 %v2661_v50  ;;  %2519 = vmatprep.mubr.bf16.mxu1 %v2666_v52  ;;  %v2721_v48 = vld [vmem:[%s2984_s27 + $0xb0] ss:$12 sps:$4 sm:$0xff]   ;;  %s2162_s27 = sshll.u32 %s3520_s29, 2  ;;  %s2156_s29 = sshll.u32 %s2980_s28, 3 }
  0x73   : > { %2531 = vmatprep.subr.bf16.mxu0 %v2680_v63  ;;  %1723 = vperm.xlu1 %2609, %v1669_v32   ;;  %s3232_s17 = scalar_lea.vmem %s3499_s8, %s2162_s27  ;;  %s3372_s19 = scalar_lea.vmem %s3500_s9, %s2162_s27 }
  0x74   : > { %2532 = vmatpush3.bf16.msra.mxu0 %v2680_v63  ;;  %1728 = vperm.xlu0 %2608, %v1670_v35   ;;  %s3427_s27 = scalar_lea.hbm %s3501_s10, %s2296_s21 }
  0x75   : > { %2422 = vmatpush3.bf16.msra.mxu1 %v2663_v53  ;;  %2533 = vmatprep.subr.bf16.mxu0 %v2687_v4  ;;  %v3216_v53 = vld [vmem:[%s3496_s5] ss:$0 sm:$0xff] }
  0x76   : > { %2423 = vmatprep.subr.bf16.mxu1 %v2669_v55 }
  0x77   : > { %1733 = vperm.xlu1 %2609, %v1671_v38  }
  0x78   : > { %873 = vmatmul.mubr.bf16.gmra.mrb[12].mxu0 %v2667_v54  ;;  %2520 = vmatmul.mubr.bf16.gmra.mrb[12].mxu1 %v2668_v56 }
  0x79   : > { %2424 = vmatpush3.bf16.msra.mxu1 %v2670_v57  ;;  %880 = vmatprep.mubr.bf16.mxu0 %v2674_v60 }
  0x7a   : > { %2425 = vmatprep.subr.bf16.mxu1 %v2671_v59  ;;  %1450 = vmatprep.mubr.bf16.mxu1 %v2678_v62  ;;  %v3219_v62 = vstv %s456_s13  ;;  %s428_s13 = scalar_lea.vmem [#allocation6], %s2156_s29 }
  0x7b   : > { %2534 = vmatpush3.bf16.msra.mxu0 %v2687_v4  ;;  %1738 = vperm.xlu0 %2608, %v1672_v39   ;;  %s2005_s14 = sshll.u32 %s428_s13, 4  ;;  %s3429_s14 = int_to_ptr.vmem [resolvable:$true] %s2005_s14 }
  0x7c   : > { %2535 = vmatprep.subr.bf16.mxu0 %v2694_v5  ;;  %1743 = vperm.xlu1 %2609, %v1673_v40   ;;  %s2752_s24 = scalar_lea.vmem %s3429_s14, 128 }
  0x7d   : > { %2426 = vmatpush3.bf16.msra.mxu1 %v2673_v61  ;;  %p2753_p10 = scmp.ne.s32.totalorder %s3429_s14, %s2752_s24 }
  0x7f   : > { %2536 = vmatpush3.bf16.msra.mxu0 %v2694_v5  ;;  %1748 = vperm.xlu0 %2608, %v1674_v43   ;;  %p2754_p12 = pnand %p2753_p10, %p3512_p11 }
  0x80   : > { %881 = vmatmul.mubr.bf16.gmra.mrb[16].mxu0 %v2679_v1  ;;  %1451 = vmatmul.mubr.bf16.vlgmr.msra.gmra.mrb[16].mxu1 %v2676_v0 }
  0x81   : > { %888 = vmatprep.mubr.bf16.mxu0 %v2681_v2  ;;  %1458 = vmatprep.mubr.bf16.mxu1 %v2683_v3  ;;  %p2755_p8 = pneg %p2754_p12 }
  0x82   : > { %2537 = vmatprep.subr.bf16.mxu0 %v2701_v9  ;;  %1753 = vperm.xlu1 %2609, %v1675_v46  }
  0x83   : > { %2538 = vmatpush3.bf16.msra.mxu0 %v2701_v9 }
  0x88   : > { %889 = vmatmul.mubr.bf16.gmra.mrb[20].mxu0 %v2685_v6  ;;  %1459 = vmatmul.mubr.bf16.gmra.mrb[20].mxu1 %v2686_v7 }
  0x89   : > { %896 = vmatprep.mubr.bf16.mxu0 %v2688_v8  ;;  %1466 = vmatprep.mubr.bf16.mxu1 %v2690_v10 }
  0x90   : > { %897 = vmatmul.mubr.bf16.gmra.mrb[24].mxu0 %v2692_v11  ;;  %1467 = vmatmul.mubr.bf16.gmra.mrb[24].mxu1 %v2693_v12 }
  0x91   : > { %904 = vmatprep.mubr.bf16.mxu0 %v2695_v13  ;;  %1474 = vmatprep.mubr.bf16.mxu1 %v2697_v14 }
  0x98   : > { %905 = vmatmul.mubr.bf16.gmra.mrb[28].mxu0 %v2699_v17  ;;  %1475 = vmatmul.mubr.bf16.gmra.mrb[28].mxu1 %v2700_v18 }
  0x99   : > { %1482 = vmatprep.mubr.bf16.mxu1 %v2702_v20  ;;  %2539 = vmatprep.mubr.bf16.mxu0 %v2704_v21 }
  0xa0   : > { %1483 = vmatmul.mubr.bf16.gmra.mrb[32].mxu1 %v2705_v25  ;;  %2540 = vmatmul.mubr.bf16.vlgmr.msra.gmra.mrb[32].mxu0 %v2706_v26 }
  0xa1   : > { %1490 = vmatprep.mubr.bf16.mxu1 %v2707_v28  ;;  %2543 = vmatprep.mubr.bf16.mxu0 %v2709_v29 }
  0xa8   : > { %1491 = vmatmul.mubr.bf16.gmra.mrb[36].mxu1 %v2710_v33  ;;  %2544 = vmatmul.mubr.bf16.gmra.mrb[36].mxu0 %v2711_v34 }
  0xa9   : > { %1498 = vmatprep.mubr.bf16.mxu1 %v2712_v36  ;;  %2547 = vmatprep.mubr.bf16.mxu0 %v2714_v37 }
  0xb0   : > { %1499 = vmatmul.mubr.bf16.gmra.mrb[40].mxu1 %v2715_v41  ;;  %2548 = vmatmul.mubr.bf16.gmra.mrb[40].mxu0 %v2716_v42 }
  0xb1   : > { %1506 = vmatprep.mubr.bf16.mxu1 %v2717_v44  ;;  %2551 = vmatprep.mubr.bf16.mxu0 %v2719_v45 }
  0xb8   : > { %1507 = vmatmul.mubr.bf16.gmra.mrb[44].mxu1 %v2720_v47  ;;  %2552 = vmatmul.mubr.bf16.gmra.mrb[44].mxu0 %v2721_v48 }
  0xd7   : > { %v1679_v49 = vpop.permute.xlu0 %1678 }
  0xda   : > { %v1689_v2 = vpop.permute.xlu1 %1688 }
  0xdb   : > { %v1684_v1 = vpop.permute.xlu0 %1683 }
  0xde   : > { %v1694_v27 = vpop.permute.xlu1 %1693 }
 0x133   : > { %v2347_v50 = vpop.f32.mrb[0].mxu0  ;;  %v2509_v51 = vpop.f32.mrb[0].mxu1 }
 0x134   : > { %v2348_v52 = vpop.f32.mrb[1].mxu0  ;;  %v947_v54 = vpop.f32.mrb[1].mxu1 }
 0x135   : > { %v2349_v55 = vadd.f32 %v2348_v52, %v2347_v50  ;;  %v2350_v56 = vpop.f32.mrb[2].mxu0  ;;  %v2510_v57 = vpop.f32.mrb[2].mxu1 }
 0x136   : > { %v2351_v58 = vpop.f32.mrb[3].mxu0  ;;  %v950_v59 = vpop.f32.mrb[3].mxu1 }
 0x137   : > { %v851_v60 = vadd.f32 %v2349_v55, %v3216_v53  ;;  %v2352_v61 = vadd.f32 %v2351_v58, %v2350_v56  ;;  %v1699_v55 = vpop.permute.xlu0 %1698  ;;  %v1704_v56 = vpop.permute.xlu1 %1703 }
 0x139   : > { %v948_v63 = vadd.f32 %v947_v54, %v851_v60  ;;  %v854_v0 = vadd.f32 %v2352_v61, %v3216_v53 }
 0x13b   : > { %v1027_v3 = vmul.f32 %v3219_v62, %v948_v63  ;;  %v951_v4 = vadd.f32 %v950_v59, %v854_v0  ;;  %vm1010_vm0 = vcmp.gt.f32.partialorder %v948_v63, 0.0  ;;  %v2353_v5 = vpop.f32.mrb[4].mxu0  ;;  %v3224_v6 = vpop.f32.mrb[4].mxu1 }
 0x13c   : > { %v2354_v7 = vpop.f32.mrb[5].mxu0  ;;  %v963_v8 = vpop.f32.mrb[5].mxu1 }
 0x13d   : > { %v1028_v9 = vmul.f32 %v3219_v62, %v951_v4  ;;  %v1043_v10 = vsel %vm1010_vm0, %v948_v63, %v1027_v3  ;;  %v2355_v11 = vadd.f32 %v2354_v7, %v2353_v5  ;;  %v2356_v12 = vpop.f32.mrb[6].mxu0  ;;  %v3234_v13 = vpop.f32.mrb[6].mxu1  ;;  %vm1011_vm2 = vcmp.gt.f32.partialorder %v951_v4, 0.0 }
 0x13e   : > { %v1756_v14 = vmul.f32 %v1679_v49, %v1043_v10  ;;  %v2299_v15 = vpack.c.bf16 %v1043_v10, %v1043_v10  ;;  %v2357_v16 = vpop.f32.mrb[7].mxu0  ;;  %v966_v17 = vpop.f32.mrb[7].mxu1  ;;  %vm1956_vm0 = vcmask 257024  }
 0x13f   : > { %v859_v18 = vadd.f32 %v2355_v11, %v3216_v53  ;;  %v2358_v19 = vadd.f32 %v2357_v16, %v2356_v12  ;;  %v1044_v20 = vsel %vm1011_vm2, %v951_v4, %v1028_v9 }
 0x140   : > { %1876 = vst.msk [vmem:[%s3232_s17] sm:$0xf] %vm1875_vm1, %v2299_v15  ;;  %v1757_v21 = vmul.f32 %v1684_v1, %v1044_v20  ;;  %v2300_v22 = vpack.c.bf16 %v1044_v20, %v1044_v20  ;;  %v1773_v25 = vsel %vm1772_vm3, %v1756_v14, 0.0 }
 0x141   : > { %v956_v23 = vadd.f32 %v2509_v51, %v859_v18  ;;  %v862_v24 = vadd.f32 %v2358_v19, %v3216_v53 }
 0x142   : > { %v1774_v26 = vsel %vm1772_vm3, %v1757_v21, 0.0  ;;  %1877 = vst.msk [vmem:[%s3232_s17 + $0x4] sm:$0xf] %vm1875_vm1, %v2300_v22  ;;  %v1709_v22 = vpop.permute.xlu0 %1708 }
 0x143   : > { %v959_v28 = vadd.f32 %v2510_v57, %v862_v24  ;;  %v1775_v29 = vadd.f32 %v1774_v26, %v1773_v25  ;;  %vm1012_vm4 = vcmp.gt.f32.partialorder %v956_v23, 0.0  ;;  %v1029_v30 = vmul.f32 %v3219_v62, %v956_v23  ;;  %v2359_v31 = vpop.f32.mrb[8].mxu0  ;;  %v3245_v32 = vpop.f32.mrb[8].mxu1 }
 0x144   : > { %v2360_v33 = vpop.f32.mrb[9].mxu0  ;;  %v3247_v34 = vpop.f32.mrb[9].mxu1 }
 0x145   : > { %v1045_v35 = vsel %vm1012_vm4, %v956_v23, %v1029_v30  ;;  %v2361_v36 = vadd.f32 %v2360_v33, %v2359_v31  ;;  %v2362_v37 = vpop.f32.mrb[10].mxu0  ;;  %v3249_v38 = vpop.f32.mrb[10].mxu1  ;;  %vm1013_vm5 = vcmp.gt.f32.partialorder %v959_v28, 0.0  ;;  %v1030_v39 = vmul.f32 %v3219_v62, %v959_v28 }
 0x146   : > { %v1758_v40 = vmul.f32 %v1689_v2, %v1045_v35  ;;  %v2301_v41 = vpack.c.bf16 %v1045_v35, %v1045_v35  ;;  %v2363_v42 = vpop.f32.mrb[11].mxu0  ;;  %v3252_v43 = vpop.f32.mrb[11].mxu1 }
 0x147   : > { %v867_v44 = vadd.f32 %v2361_v36, %v3216_v53  ;;  %v2364_v45 = vadd.f32 %v2363_v42, %v2362_v37  ;;  %v1046_v46 = vsel %vm1013_vm5, %v959_v28, %v1030_v39  ;;  %v1714_v23 = vpop.permute.xlu1 %1713 }
 0x148   : > { %v1776_v47 = vsel %vm1772_vm3, %v1758_v40, 0.0  ;;  %1878 = vst.msk [vmem:[%s3232_s17 + $0x8] sm:$0xf] %vm1875_vm1, %v2301_v41  ;;  %v1759_v48 = vmul.f32 %v1694_v27, %v1046_v46  ;;  %v2302_v49 = vpack.c.bf16 %v1046_v46, %v1046_v46 }
 0x149   : > { %v1777_v50 = vadd.f32 %v1776_v47, %v1775_v29  ;;  %v964_v51 = vadd.f32 %v963_v8, %v867_v44  ;;  %v870_v52 = vadd.f32 %v2364_v45, %v3216_v53 }
 0x14a   : > { %v1778_v54 = vsel %vm1772_vm3, %v1759_v48, 0.0  ;;  %1879 = vst.msk [vmem:[%s3232_s17 + $0xc] sm:$0xf] %vm1875_vm1, %v2302_v49 }
 0x14b   : > { %v967_v57 = vadd.f32 %v966_v17, %v870_v52  ;;  %v1779_v58 = vadd.f32 %v1778_v54, %v1777_v50  ;;  %v2365_v59 = vpop.f32.mrb[12].mxu0  ;;  %v3262_v60 = vpop.f32.mrb[12].mxu1  ;;  %vm1014_vm6 = vcmp.gt.f32.partialorder %v964_v51, 0.0  ;;  %v1031_v61 = vmul.f32 %v3219_v62, %v964_v51 }
 0x14c   : > { %v2366_v63 = vpop.f32.mrb[13].mxu0  ;;  %v3265_v0 = vpop.f32.mrb[13].mxu1 }
 0x14d   : > { %v2367_v1 = vadd.f32 %v2366_v63, %v2365_v59  ;;  %v1047_v2 = vsel %vm1014_vm6, %v964_v51, %v1031_v61  ;;  %v2368_v3 = vpop.f32.mrb[14].mxu0  ;;  %v3267_v4 = vpop.f32.mrb[14].mxu1  ;;  %vm1015_vm7 = vcmp.gt.f32.partialorder %v967_v57, 0.0  ;;  %v1032_v5 = vmul.f32 %v3219_v62, %v967_v57 }
 0x14e   : > { %v1760_v7 = vmul.f32 %v1699_v55, %v1047_v2  ;;  %v2303_v8 = vpack.c.bf16 %v1047_v2, %v1047_v2  ;;  %v2369_v9 = vpop.f32.mrb[15].mxu0  ;;  %v3270_v10 = vpop.f32.mrb[15].mxu1 }
 0x14f   : > { %v875_v11 = vadd.f32 %v2367_v1, %v3216_v53  ;;  %v2370_v12 = vadd.f32 %v2369_v9, %v2368_v3  ;;  %v1048_v14 = vsel %vm1015_vm7, %v967_v57, %v1032_v5  ;;  %v1719_v54 = vpop.permute.xlu0 %1718  ;;  %v1724_v55 = vpop.permute.xlu1 %1723 }
 0x150   : > { %v1780_v15 = vsel %vm1772_vm3, %v1760_v7, 0.0  ;;  %1880 = vst.msk [vmem:[%s3232_s17 + $0x10] sm:$0xf] %vm1875_vm1, %v2303_v8  ;;  %v1761_v16 = vmul.f32 %v1704_v56, %v1048_v14  ;;  %v2304_v17 = vpack.c.bf16 %v1048_v14, %v1048_v14 }
 0x151   : > { %v972_v18 = vadd.f32 %v3224_v6, %v875_v11  ;;  %v1781_v19 = vadd.f32 %v1780_v15, %v1779_v58  ;;  %v878_v20 = vadd.f32 %v2370_v12, %v3216_v53 }
 0x152   : > { %v1782_v21 = vsel %vm1772_vm3, %v1761_v16, 0.0  ;;  %1881 = vst.msk [vmem:[%s3232_s17 + $0x14] sm:$0xf] %vm1875_vm1, %v2304_v17 }
 0x153   : > { %v975_v24 = vadd.f32 %v3234_v13, %v878_v20  ;;  %v1783_v25 = vadd.f32 %v1782_v21, %v1781_v19  ;;  %v2371_v26 = vpop.f32.mrb[16].mxu0  ;;  %v2427_v27 = vpop.f32.mrb[16].mxu1  ;;  %vm1016_vm8 = vcmp.gt.f32.partialorder %v972_v18, 0.0  ;;  %v1033_v28 = vmul.f32 %v3219_v62, %v972_v18 }
 0x154   : > { %v2372_v29 = vpop.f32.mrb[17].mxu0  ;;  %v2428_v30 = vpop.f32.mrb[17].mxu1 }
 0x155   : > { %v2373_v6 = vadd.f32 %v2372_v29, %v2371_v26  ;;  %v3283_v31 = vadd.f32 %v2428_v30, %v2427_v27  ;;  %v1049_v33 = vsel %vm1016_vm8, %v972_v18, %v1033_v28  ;;  %v2374_v35 = vpop.f32.mrb[18].mxu0  ;;  %v2430_v36 = vpop.f32.mrb[18].mxu1  ;;  %vm1017_vm9 = vcmp.gt.f32.partialorder %v975_v24, 0.0 }
 0x156   : > { %v1762_v37 = vmul.f32 %v1709_v22, %v1049_v33  ;;  %v2305_v39 = vpack.c.bf16 %v1049_v33, %v1049_v33  ;;  %v2375_v40 = vpop.f32.mrb[19].mxu0  ;;  %v2431_v13 = vpop.f32.mrb[19].mxu1  ;;  %v1034_v41 = vmul.f32 %v3219_v62, %v975_v24 }
 0x157   : > { %v883_v42 = vadd.f32 %v2373_v6, %v3216_v53  ;;  %v2376_v44 = vadd.f32 %v2375_v40, %v2374_v35  ;;  %v3287_v45 = vadd.f32 %v2431_v13, %v2430_v36 }
 0x158   : > { %v1784_v46 = vsel %vm1772_vm3, %v1762_v37, 0.0  ;;  %1882 = vst.msk [vmem:[%s3232_s17 + $0x18] sm:$0xf] %vm1875_vm1, %v2305_v39  ;;  %v1050_v47 = vsel %vm1017_vm9, %v975_v24, %v1034_v41 }
 0x159   : > { %v980_v48 = vadd.f32 %v3247_v34, %v883_v42  ;;  %v1785_v49 = vadd.f32 %v1784_v46, %v1783_v25  ;;  %v886_v50 = vadd.f32 %v2376_v44, %v3216_v53  ;;  %v1763_v51 = vmul.f32 %v1714_v23, %v1050_v47  ;;  %v1729_v25 = vpop.permute.xlu0 %1728  ;;  %v1734_v46 = vpop.permute.xlu1 %1733 }
 0x15a   : > { %v2306_v52 = vpack.c.bf16 %v1050_v47, %v1050_v47 }
 0x15b   : > { %v983_v56 = vadd.f32 %v3252_v43, %v886_v50  ;;  %v1786_v57 = vsel %vm1772_vm3, %v1763_v51, 0.0  ;;  %v2377_v58 = vpop.f32.mrb[20].mxu0  ;;  %v2433_v59 = vpop.f32.mrb[20].mxu1  ;;  %vm1018_vm10 = vcmp.gt.f32.partialorder %v980_v48, 0.0  ;;  %v1035_v61 = vmul.f32 %v3219_v62, %v980_v48 }
 0x15c   : > { %v1787_v63 = vadd.f32 %v1786_v57, %v1785_v49  ;;  %1883 = vst.msk [vmem:[%s3232_s17 + $0x1c] sm:$0xf] %vm1875_vm1, %v2306_v52  ;;  %v2378_v34 = vpop.f32.mrb[21].mxu0  ;;  %v2434_v1 = vpop.f32.mrb[21].mxu1 }
 0x15d   : > { %v1051_v2 = vsel %vm1018_vm10, %v980_v48, %v1035_v61  ;;  %v2379_v3 = vadd.f32 %v2378_v34, %v2377_v58  ;;  %v3299_v5 = vadd.f32 %v2434_v1, %v2433_v59  ;;  %v2380_v7 = vpop.f32.mrb[22].mxu0  ;;  %v2436_v8 = vpop.f32.mrb[22].mxu1  ;;  %vm1019_vm11 = vcmp.gt.f32.partialorder %v983_v56, 0.0 }
 0x15e   : > { %v1764_v43 = vmul.f32 %v1719_v54, %v1051_v2  ;;  %v2307_v9 = vpack.c.bf16 %v1051_v2, %v1051_v2  ;;  %v2381_v11 = vpop.f32.mrb[23].mxu0  ;;  %v2437_v12 = vpop.f32.mrb[23].mxu1  ;;  %v1036_v14 = vmul.f32 %v3219_v62, %v983_v56 }
 0x15f   : > { %v891_v15 = vadd.f32 %v2379_v3, %v3216_v53  ;;  %v2382_v16 = vadd.f32 %v2381_v11, %v2380_v7  ;;  %v3303_v17 = vadd.f32 %v2437_v12, %v2436_v8  ;;  %v1739_v59 = vpop.permute.xlu0 %1738 }
 0x160   : > { %v1788_v18 = vsel %vm1772_vm3, %v1764_v43, 0.0  ;;  %1884 = vst.msk [vmem:[%s3232_s17 + $0x20] sm:$0xf] %vm1875_vm1, %v2307_v9  ;;  %v1052_v19 = vsel %vm1019_vm11, %v983_v56, %v1036_v14 }
 0x161   : > { %v1789_v20 = vadd.f32 %v1788_v18, %v1787_v63  ;;  %v988_v21 = vadd.f32 %v3245_v32, %v891_v15  ;;  %v894_v22 = vadd.f32 %v2382_v16, %v3216_v53  ;;  %v1765_v23 = vmul.f32 %v1724_v55, %v1052_v19 }
 0x162   : > { %v2308_v24 = vpack.c.bf16 %v1052_v19, %v1052_v19 }
 0x163   : > { %v991_v26 = vadd.f32 %v3249_v38, %v894_v22  ;;  %v1790_v27 = vsel %vm1772_vm3, %v1765_v23, 0.0  ;;  %vm1020_vm12 = vcmp.gt.f32.partialorder %v988_v21, 0.0  ;;  %v1037_v28 = vmul.f32 %v3219_v62, %v988_v21  ;;  %v2383_v29 = vpop.f32.mrb[24].mxu0  ;;  %v2439_v30 = vpop.f32.mrb[24].mxu1  ;;  %v3338_v23 = vld [vmem:[%s3497_s6] ss:$0 sm:$0xff] }
 0x164   : > { %v1791_v6 = vadd.f32 %v1790_v27, %v1789_v20  ;;  %1885 = vst.msk [vmem:[%s3232_s17 + $0x24] sm:$0xf] %vm1875_vm1, %v2308_v24  ;;  %v2384_v33 = vpop.f32.mrb[25].mxu0  ;;  %v2440_v35 = vpop.f32.mrb[25].mxu1 }
 0x165   : > { %v1053_v32 = vsel %vm1020_vm12, %v988_v21, %v1037_v28  ;;  %vm1021_vm13 = vcmp.gt.f32.partialorder %v991_v26, 0.0  ;;  %v1038_v36 = vmul.f32 %v3219_v62, %v991_v26  ;;  %v2385_v37 = vadd.f32 %v2384_v33, %v2383_v29  ;;  %v2386_v39 = vpop.f32.mrb[26].mxu0  ;;  %v2442_v38 = vpop.f32.mrb[26].mxu1 }
 0x166   : > { %v1766_v40 = vmul.f32 %v1729_v25, %v1053_v32  ;;  %v2309_v13 = vpack.c.bf16 %v1053_v32, %v1053_v32  ;;  %v3316_v41 = vadd.f32 %v2440_v35, %v2439_v30  ;;  %v2387_v42 = vpop.f32.mrb[27].mxu0  ;;  %v2443_v44 = vpop.f32.mrb[27].mxu1  ;;  %v1461_v33 = vadd.f32 %v3299_v5, %v3338_v23 }
 0x167   : > { %v1054_v47 = vsel %vm1021_vm13, %v991_v26, %v1038_v36  ;;  %v899_v48 = vadd.f32 %v2385_v37, %v3216_v53  ;;  %v2388_v49 = vadd.f32 %v2387_v42, %v2386_v39  ;;  %v2444_v50 = vadd.f32 %v2443_v44, %v2442_v38 }
 0x168   : > { %v1792_v51 = vsel %vm1772_vm3, %v1766_v40, 0.0  ;;  %1886 = vst.msk [vmem:[%s3232_s17 + $0x28] sm:$0xf] %vm1875_vm1, %v2309_v13  ;;  %v1767_v52 = vmul.f32 %v1734_v46, %v1054_v47  ;;  %v2310_v54 = vpack.c.bf16 %v1054_v47, %v1054_v47  ;;  %v1453_v35 = vadd.f32 %v3283_v31, %v3338_v23 }
 0x169   : > { %v1793_v55 = vadd.f32 %v1792_v51, %v1791_v6  ;;  %v996_v56 = vadd.f32 %v3265_v0, %v899_v48  ;;  %v902_v57 = vadd.f32 %v2388_v49, %v3216_v53  ;;  %v1749_v6 = vpop.permute.xlu0 %1748  ;;  %v1456_v32 = vadd.f32 %v3287_v45, %v3338_v23 }
 0x16a   : > { %v1794_v58 = vsel %vm1772_vm3, %v1767_v52, 0.0  ;;  %1887 = vst.msk [vmem:[%s3232_s17 + $0x2c] sm:$0xf] %vm1875_vm1, %v2310_v54  ;;  %v1464_v5 = vadd.f32 %v3303_v17, %v3338_v23  ;;  %v1469_v31 = vadd.f32 %v3316_v41, %v3338_v23  ;;  %v3361_v42 = vadd.f32 %v2444_v50, %v3338_v23 }
 0x16b   : > { %v1795_v61 = vadd.f32 %v1794_v58, %v1793_v55  ;;  %vm1022_vm14 = vcmp.gt.f32.partialorder %v996_v56, 0.0  ;;  %v1039_v63 = vmul.f32 %v3219_v62, %v996_v56  ;;  %v999_v34 = vadd.f32 %v3270_v10, %v902_v57  ;;  %v2389_v1 = vpop.f32.mrb[28].mxu0  ;;  %v2445_v2 = vpop.f32.mrb[28].mxu1 }
 0x16c   : > { %v2390_v3 = vpop.f32.mrb[29].mxu0  ;;  %v2446_v7 = vpop.f32.mrb[29].mxu1 }
 0x16d   : > { %v1055_v8 = vsel %vm1022_vm14, %v996_v56, %v1039_v63  ;;  %vm1023_vm15 = vcmp.gt.f32.partialorder %v999_v34, 0.0  ;;  %v1040_v0 = vmul.f32 %v3219_v62, %v999_v34  ;;  %v2391_v43 = vadd.f32 %v2390_v3, %v2389_v1  ;;  %v2392_v9 = vpop.f32.mrb[30].mxu0  ;;  %v2448_v11 = vpop.f32.mrb[30].mxu1 }
 0x16e   : > { %v2311_v12 = vpack.c.bf16 %v1055_v8, %v1055_v8  ;;  %v1768_v14 = vmul.f32 %v1739_v59, %v1055_v8  ;;  %v3330_v15 = vadd.f32 %v2446_v7, %v2445_v2  ;;  %v2393_v16 = vpop.f32.mrb[31].mxu0  ;;  %v2449_v18 = vpop.f32.mrb[31].mxu1 }
 0x16f   : > { %v1744_v10 = vpop.permute.xlu1 %1743  ;;  %v1056_v19 = vsel %vm1023_vm15, %v999_v34, %v1040_v0  ;;  %v907_v20 = vadd.f32 %v2391_v43, %v3216_v53  ;;  %v2394_v21 = vadd.f32 %v2393_v16, %v2392_v9  ;;  %v3333_v22 = vadd.f32 %v2449_v18, %v2448_v11 }
 0x170   : > { %1888 = vst.msk [vmem:[%s3232_s17 + $0x30] sm:$0xf] %vm1875_vm1, %v2311_v12  ;;  %v1769_v24 = vmul.f32 %v1744_v10, %v1056_v19  ;;  %v1796_v25 = vsel %vm1772_vm3, %v1768_v14, 0.0  ;;  %v2312_v26 = vpack.c.bf16 %v1056_v19, %v1056_v19  ;;  %v1477_v9 = vadd.f32 %v3330_v15, %v3338_v23 }
 0x171   : > { %v1797_v27 = vadd.f32 %v1796_v25, %v1795_v61  ;;  %v1004_v28 = vadd.f32 %v3262_v60, %v907_v20  ;;  %v910_v29 = vadd.f32 %v2394_v21, %v3216_v53  ;;  %v1480_v12 = vadd.f32 %v3333_v22, %v3338_v23 }
 0x172   : > { %v1798_v30 = vsel %vm1772_vm3, %v1769_v24, 0.0  ;;  %1889 = vst.msk [vmem:[%s3232_s17 + $0x34] sm:$0xf] %vm1875_vm1, %v2312_v26 }
 0x173   : > { %v1799_v36 = vadd.f32 %v1798_v30, %v1797_v27  ;;  %vm1024_vm2 = vcmp.gt.f32.partialorder %v1004_v28, 0.0  ;;  %v1041_v60 = vmul.f32 %v3219_v62, %v1004_v28  ;;  %v1007_v53 = vadd.f32 %v3267_v4, %v910_v29  ;;  %v2451_v37 = vpop.f32.mrb[32].mxu1  ;;  %v2541_v39 = vpop.f32.mrb[32].mxu0 }
 0x174   : > { %v1558_v38 = vadd.f32 %v2541_v39, %v1461_v33  ;;  %v2452_v40 = vpop.f32.mrb[33].mxu1  ;;  %v1549_v13 = vpop.f32.mrb[33].mxu0 }
 0x175   : > { %v1057_v45 = vsel %vm1024_vm2, %v1004_v28, %v1041_v60  ;;  %vm1025_vm4 = vcmp.gt.f32.partialorder %v1007_v53, 0.0  ;;  %v1042_v44 = vmul.f32 %v3219_v62, %v1007_v53  ;;  %v2453_v4 = vadd.f32 %v2452_v40, %v2451_v37  ;;  %v2454_v46 = vpop.f32.mrb[34].mxu1  ;;  %v2542_v47 = vpop.f32.mrb[34].mxu0 }
 0x176   : > { %v1770_v48 = vmul.f32 %v1749_v6, %v1057_v45  ;;  %v2313_v49 = vpack.c.bf16 %v1057_v45, %v1057_v45  ;;  %vm1614_vm5 = vcmp.gt.f32.partialorder %v1558_v38, 0.0  ;;  %v1630_v17 = vmul.f32 %v1558_v38, %v3219_v62  ;;  %v2455_v51 = vpop.f32.mrb[35].mxu1  ;;  %v1552_v52 = vpop.f32.mrb[35].mxu0 }
 0x177   : > { %v1754_v41 = vpop.permute.xlu1 %1753  ;;  %v1058_v50 = vsel %vm1025_vm4, %v1007_v53, %v1042_v44  ;;  %v1550_v54 = vadd.f32 %v1549_v13, %v1453_v35  ;;  %v1561_v55 = vadd.f32 %v2542_v47, %v1464_v5  ;;  %v3365_v56 = vadd.f32 %v2455_v51, %v2454_v46 }
 0x178   : > { %v1800_v57 = vsel %vm1772_vm3, %v1770_v48, 0.0  ;;  %1890 = vst.msk [vmem:[%s3232_s17 + $0x38] sm:$0xf] %vm1875_vm1, %v2313_v49  ;;  %v1771_v58 = vmul.f32 %v1754_v41, %v1058_v50  ;;  %v2314_v59 = vpack.c.bf16 %v1058_v50, %v1058_v50  ;;  %v1646_v61 = vsel %vm1614_vm5, %v1558_v38, %v1630_v17 }
 0x179   : > { %v1801_v63 = vadd.f32 %v1800_v57, %v1799_v36  ;;  %v2317_v34 = vpack.c.bf16 %v1646_v61, %v1646_v61  ;;  %vm1612_vm6 = vcmp.gt.f32.partialorder %v1550_v54, 0.0  ;;  %v1628_v1 = vmul.f32 %v1550_v54, %v3219_v62 }
 0x17a   : > { %v1802_v2 = vsel %vm1772_vm3, %v1771_v58, 0.0  ;;  %1891 = vst.msk [vmem:[%s3232_s17 + $0x3c] sm:$0xf] %vm1875_vm1, %v2314_v59  ;;  %vm1615_vm7 = vcmp.gt.f32.partialorder %v1561_v55, 0.0  ;;  %v1631_v3 = vmul.f32 %v1561_v55, %v3219_v62  ;;  %v1553_v7 = vadd.f32 %v1552_v52, %v1456_v32  ;;  %s2824_s17 = smov [#allocation6]  }
 0x17b   : > { %v1803_v8 = vadd.f32 %v1802_v2, %v1801_v63  ;;  %1959 = vst.msk [vmem:[%s3372_s19 + $0x8] sm:$0xf] %vm1956_vm0, %v2317_v34  ;;  %v1644_v0 = vsel %vm1612_vm6, %v1550_v54, %v1628_v1  ;;  %v2457_v43 = vpop.f32.mrb[36].mxu1  ;;  %v2545_v11 = vpop.f32.mrb[36].mxu0  ;;  %v1485_v6 = vadd.f32 %v2453_v4, %v3338_v23  ;;  %v1488_v51 = vadd.f32 %v3365_v56, %v3338_v23  ;;  %s2756_s23 = sshll.u32 %s2824_s17, 4  ;;  %s2757_s23 = int_to_ptr.vmem [resolvable:$false] %s2756_s23 }
 0x17c   : > { %v2315_v14 = vpack.c.bf16 %v1644_v0, %v1644_v0  ;;  %v1647_v16 = vsel %vm1615_vm7, %v1561_v55, %v1631_v3  ;;  %vm1613_vm1 = vcmp.gt.f32.partialorder %v1553_v7, 0.0  ;;  %v1629_v18 = vmul.f32 %v1553_v7, %v3219_v62  ;;  %v2458_v10 = vpop.f32.mrb[37].mxu1  ;;  %v1565_v19 = vpop.f32.mrb[37].mxu0  ;;  %s2758_s22 = scalar_lea.vmem %s2757_s23, 256  ;;  %p2759_p9 = scmp.lt.s32.totalorder %s3429_s14, %s2757_s23 }
 0x17d   : > { %v1804_v20 = vrot.slane %v1803_v8, 4  ;;  %v2318_v21 = vpack.c.bf16 %v1647_v16, %v1647_v16  ;;  %v1574_v24 = vadd.f32 %v2545_v11, %v1477_v9  ;;  %v2459_v25 = vadd.f32 %v2458_v10, %v2457_v43  ;;  %v2460_v26 = vpop.f32.mrb[38].mxu1  ;;  %v2546_v27 = vpop.f32.mrb[38].mxu0  ;;  %p2760_p13 = scmp.lt.s32.totalorder %s2758_s22, %s2752_s24 }
 0x17e   : > { %1957 = vst.msk [vmem:[%s3372_s19] sm:$0xf] %vm1956_vm0, %v2315_v14  ;;  %v1645_v15 = vsel %vm1613_vm1, %v1553_v7, %v1629_v18  ;;  %v1566_v28 = vadd.f32 %v1565_v19, %v1469_v31  ;;  %v1577_v22 = vadd.f32 %v2546_v27, %v1480_v12  ;;  %v2461_v29 = vpop.f32.mrb[39].mxu1  ;;  %v1568_v30 = vpop.f32.mrb[39].mxu0 }
 0x17f   : > { %v1805_v33 = vadd.f32 %v1804_v20, %v1803_v8  ;;  %1960 = vst.msk [vmem:[%s3372_s19 + $0xc] sm:$0xf] %vm1956_vm0, %v2318_v21  ;;  %v2316_v35 = vpack.c.bf16 %v1645_v15, %v1645_v15  ;;  %vm1618_vm8 = vcmp.gt.f32.partialorder %v1574_v24, 0.0  ;;  %v1634_v32 = vmul.f32 %v1574_v24, %v3219_v62  ;;  %p2761_p1 = por %p2760_p13, %p2759_p9 }
 0x180   : > { %vm1616_vm9 = vcmp.gt.f32.partialorder %v1566_v28, 0.0  ;;  %v1632_v36 = vmul.f32 %v1566_v28, %v3219_v62  ;;  %vm1619_vm10 = vcmp.gt.f32.partialorder %v1577_v22, 0.0  ;;  %v1635_v60 = vmul.f32 %v1577_v22, %v3219_v62 }
 0x181   : > { %v1806_v53 = vrot.slane %v1805_v33, 2  ;;  %1958 = vst.msk [vmem:[%s3372_s19 + $0x4] sm:$0xf] %vm1956_vm0, %v2316_v35  ;;  %v1650_v37 = vsel %vm1618_vm8, %v1574_v24, %v1634_v32  ;;  %v2462_v39 = vadd.f32 %v2461_v29, %v2460_v26  ;;  %v1569_v38 = vadd.f32 %v1568_v30, %v3361_v42  ;;  %p2762_p3 = pnand %p2761_p1, %p2755_p8 }
 0x182   : > { %v2321_v40 = vpack.c.bf16 %v1650_v37, %v1650_v37  ;;  %v1648_v13 = vsel %vm1616_vm9, %v1566_v28, %v1632_v36  ;;  %v1651_v5 = vsel %vm1619_vm10, %v1577_v22, %v1635_v60  ;;  %v1493_v31 = vadd.f32 %v2459_v25, %v3338_v23 }
 0x183   : > { %v2319_v45 = vpack.c.bf16 %v1648_v13, %v1648_v13  ;;  %v2322_v44 = vpack.c.bf16 %v1651_v5, %v1651_v5  ;;  %vm1617_vm11 = vcmp.gt.f32.partialorder %v1569_v38, 0.0  ;;  %v1633_v4 = vmul.f32 %v1569_v38, %v3219_v62  ;;  %v2463_v46 = vpop.f32.mrb[40].mxu1  ;;  %v2549_v47 = vpop.f32.mrb[40].mxu0 }
 0x184   : > { %1963 = vst.msk [vmem:[%s3372_s19 + $0x18] sm:$0xf] %vm1956_vm0, %v2321_v40  ;;  %v1590_v48 = vadd.f32 %v2549_v47, %v1493_v31  ;;  %v2464_v49 = vpop.f32.mrb[41].mxu1  ;;  %v1581_v42 = vpop.f32.mrb[41].mxu0  ;;  %v1496_v17 = vadd.f32 %v2462_v39, %v3338_v23  ;;  %v1807_v57 = vadd.f32 %v1806_v53, %v1805_v33 }
 0x185   : > { %1961 = vst.msk [vmem:[%s3372_s19 + $0x10] sm:$0xf] %vm1956_vm0, %v2319_v45  ;;  %1964 = vst.msk [vmem:[%s3372_s19 + $0x1c] sm:$0xf] %vm1956_vm0, %v2322_v44  ;;  %v1649_v52 = vsel %vm1617_vm11, %v1569_v38, %v1633_v4  ;;  %v2465_v41 = vadd.f32 %v2464_v49, %v2463_v46  ;;  %v1582_v50 = vadd.f32 %v1581_v42, %v1485_v6  ;;  %v2466_v54 = vpop.f32.mrb[42].mxu1  ;;  %v2550_v55 = vpop.f32.mrb[42].mxu0 }
 0x186   : > { %v2320_v58 = vpack.c.bf16 %v1649_v52, %v1649_v52  ;;  %vm1622_vm12 = vcmp.gt.f32.partialorder %v1590_v48, 0.0  ;;  %v1638_v59 = vmul.f32 %v1590_v48, %v3219_v62  ;;  %v1593_v61 = vadd.f32 %v2550_v55, %v1496_v17  ;;  %v2467_v63 = vpop.f32.mrb[43].mxu1  ;;  %v1584_v56 = vpop.f32.mrb[43].mxu0 }
 0x187   : > { %vm1620_vm13 = vcmp.gt.f32.partialorder %v1582_v50, 0.0  ;;  %v1636_v34 = vmul.f32 %v1582_v50, %v3219_v62  ;;  %v2468_v1 = vadd.f32 %v2467_v63, %v2466_v54  ;;  %v1585_v2 = vadd.f32 %v1584_v56, %v1488_v51 }
 0x188   : > { %1962 = vst.msk [vmem:[%s3372_s19 + $0x14] sm:$0xf] %vm1956_vm0, %v2320_v58  ;;  %v1654_v3 = vsel %vm1622_vm12, %v1590_v48, %v1638_v59  ;;  %vm1623_vm14 = vcmp.gt.f32.partialorder %v1593_v61, 0.0  ;;  %v1639_v7 = vmul.f32 %v1593_v61, %v3219_v62  ;;  %v1808_v12 = vrot.slane %v1807_v57, 1 }
 0x189   : > { %v2325_v8 = vpack.c.bf16 %v1654_v3, %v1654_v3  ;;  %v1652_v0 = vsel %vm1620_vm13, %v1582_v50, %v1636_v34  ;;  %vm1621_vm15 = vcmp.gt.f32.partialorder %v1585_v2, 0.0  ;;  %v1637_v43 = vmul.f32 %v1585_v2, %v3219_v62 }
 0x18a   : > { %v2323_v9 = vpack.c.bf16 %v1652_v0, %v1652_v0  ;;  %v1655_v11 = vsel %vm1623_vm14, %v1593_v61, %v1639_v7  ;;  %v1501_v19 = vadd.f32 %v2465_v41, %v3338_v23  ;;  %v1809_v25 = vadd.f32 %v1808_v12, %v1807_v57 }
 0x18b   : > { %1967 = vst.msk [vmem:[%s3372_s19 + $0x28] sm:$0xf] %vm1956_vm0, %v2325_v8  ;;  %v2326_v14 = vpack.c.bf16 %v1655_v11, %v1655_v11  ;;  %v1653_v16 = vsel %vm1621_vm15, %v1585_v2, %v1637_v43  ;;  %v2469_v18 = vpop.f32.mrb[44].mxu1  ;;  %v2553_v10 = vpop.f32.mrb[44].mxu0  ;;  %v1504_v29 = vadd.f32 %v2468_v1, %v3338_v23 }
 0x18c   : > { %1965 = vst.msk [vmem:[%s3372_s19 + $0x20] sm:$0xf] %vm1956_vm0, %v2323_v9  ;;  %v2324_v20 = vpack.c.bf16 %v1653_v16, %v1653_v16  ;;  %v2470_v21 = vpop.f32.mrb[45].mxu1  ;;  %v1597_v24 = vpop.f32.mrb[45].mxu0 }
 0x18d   : > { %1968 = vst.msk [vmem:[%s3372_s19 + $0x2c] sm:$0xf] %vm1956_vm0, %v2326_v14  ;;  %v2471_v26 = vadd.f32 %v2470_v21, %v2469_v18  ;;  %v1598_v27 = vadd.f32 %v1597_v24, %v1501_v19  ;;  %v2472_v15 = vpop.f32.mrb[46].mxu1  ;;  %v2554_v28 = vpop.f32.mrb[46].mxu0 }
 0x18e   : > { %1966 = vst.msk [vmem:[%s3372_s19 + $0x24] sm:$0xf] %vm1956_vm0, %v2324_v20  ;;  %v2473_v22 = vpop.f32.mrb[47].mxu1  ;;  %v1600_v30 = vpop.f32.mrb[47].mxu0 }
 0x18f   : > { %1810 = vst.msk [vmem:[%s428_s13] sm:$0xff] %vm1772_vm3, %v1809_v25  ;;  %v1509_v6 = vadd.f32 %v2471_v26, %v3338_v23  ;;  %vm1624_vm2 = vcmp.gt.f32.partialorder %v1598_v27, 0.0  ;;  %v1640_v33 = vmul.f32 %v1598_v27, %v3219_v62  ;;  %v2474_v35 = vadd.f32 %v2473_v22, %v2472_v15 }
 0x190   : > { %2765 = shalt.err (!%p2762_p3)
}
 0x191   : > { %s2766_s28 = scalar_lea.hbm %s3427_s27, 128  ;;  %s2770_s29 = scalar_lea.hbm %s3501_s10, 384 }
 0x192   : > { %p2767_p4 = scmp.ne.s32.totalorder %s3427_s27, %s2766_s28  ;;  %p2771_p2 = scmp.lt.u32.totalorder %s3427_s27, %s3501_s10 }
 0x193   : > { %p2772_p7 = scmp.lt.u32.totalorder %s2770_s29, %s2766_s28  ;;  %p2774_p10 = scmp.lt.u32.totalorder %s2766_s28, %s3427_s27 }
 0x194   : > { %p2768_p5 = pnand %p2767_p4, %p3512_p11 }
 0x195   : > { %p2773_p6 = por %p2772_p7, %p2771_p2 }
 0x196   : > { %p2769_p0 = pneg %p2768_p5 }
 0x197   : > { %p2775_p12 = por %p2774_p10, %p2773_p6 }
 0x199   : > { %p2776_p8 = pnand %p2775_p12, %p2769_p0 }
 0x19b   : > { %2779 = shalt.err (!%p2776_p8)
}
 0x19c   : > { %2561 = dma.vmem_to_hbm [thread:$0]  (%p3512_p11), %s3429_s14, 128, %s3427_s27, %s1984_s12   ;;  %v1601_v32 = vadd.f32 %v1600_v30, %v1504_v29  ;;  %v1606_v36 = vadd.f32 %v2553_v10, %v1509_v6  ;;  %v1656_v60 = vsel %vm1624_vm2, %v1598_v27, %v1640_v33  ;;  %v1512_v53 = vadd.f32 %v2474_v35, %v3338_v23 }
 0x19d   : > { %v2327_v37 = vpack.c.bf16 %v1656_v60, %v1656_v60 }
 0x19e   : > { %vm1625_vm3 = vcmp.gt.f32.partialorder %v1601_v32, 0.0  ;;  %v1641_v39 = vmul.f32 %v1601_v32, %v3219_v62  ;;  %vm1626_vm4 = vcmp.gt.f32.partialorder %v1606_v36, 0.0  ;;  %v1642_v38 = vmul.f32 %v1606_v36, %v3219_v62 }
 0x19f   : > { %v1609_v40 = vadd.f32 %v2554_v28, %v1512_v53  ;;  %1969 = vst.msk [vmem:[%s3372_s19 + $0x30] sm:$0xf] %vm1956_vm0, %v2327_v37 }
 0x1a0   : > { %v1657_v13 = vsel %vm1625_vm3, %v1601_v32, %v1641_v39  ;;  %v1658_v5 = vsel %vm1626_vm4, %v1606_v36, %v1642_v38 }
 0x1a1   : > { %vm1627_vm5 = vcmp.gt.f32.partialorder %v1609_v40, 0.0  ;;  %v1643_v31 = vmul.f32 %v1609_v40, %v3219_v62  ;;  %v2328_v45 = vpack.c.bf16 %v1657_v13, %v1657_v13  ;;  %v2329_v44 = vpack.c.bf16 %v1658_v5, %v1658_v5 }
 0x1a3   : > { %v1659_v23 = vsel %vm1627_vm5, %v1609_v40, %v1643_v31  ;;  %1970 = vst.msk [vmem:[%s3372_s19 + $0x34] sm:$0xf] %vm1956_vm0, %v2328_v45  ;;  %1971 = vst.msk [vmem:[%s3372_s19 + $0x38] sm:$0xf] %vm1956_vm0, %v2329_v44 }
 0x1a4   : > { %v2330_v4 = vpack.c.bf16 %v1659_v23, %v1659_v23 }
 0x1a6   : > { %1972 = vst.msk [vmem:[%s3372_s19 + $0x3c] sm:$0xf] %vm1956_vm0, %v2330_v4 }
 0x1a7 PF: > { %p2572_p11 = scmp.ge.s32.totalorder %s2818_s18, 2  ;;  %s2033_s25 = sand.u32 1, %s2806_s15  }
 0x1a8   : > { %p3513_p9 = scmp.ne.s32.totalorder %s3509_s26, 0  ;;  %s2034_s14 = scalar_lea.sflag [#allocation5], %s2033_s25 }
 0x1aa   : > { %p2568_p13 = pnand %p2572_p11, %p3513_p9 }
 0x1ac   : > { %2801 = dma.done.wait (!%p2568_p13), %s2034_s14, 128  }
 0x1ad   : > { %2803 = vsyncadd (!%p2568_p13), %s2034_s14, 4294967168  ;;  %s3514_s7 = sld [smem:[#allocation9_spill]]  ;;  %s3515_s17 = sld [smem:[#allocation10_spill]] }
 0x1ae   : > { %p25_p1 = scmp.ge.s32.totalorder %s2908_s20, 5   ;;  %s3516_s15 = smov %s2810_s16 }
 0x1af   : > { %s3518_s18 = smov %s2908_s20 }
 0x1b0   :  { %27 = sbr.rel (!%p25_p1) target bundleno = 8 (0x8), region = 127 }
 0x1b3   : > { %s3517_s16 = smov %s3514_s7 }
 0x1b7   :  { %2039 = vsyncpa [#allocation4], 1 }
 0x1b8   :  { %2041 = vsyncpa [#allocation4 + $0x1], 1 }
 0x1b9   :  { %2042 = vsyncpa [#allocation5], 1 }
 0x1ba   :  { %2044 = vsyncpa [#allocation5 + $0x1], 1 }

</bundles_post_ra>
